<compile_context>
chip_gen: v7x
topology: tpu7x:2x2x1
jax: 0.10.0
libtpu: 0.0.40
codegen_flags: <defaults>
</compile_context>

<pallas_src>
from typing import NamedTuple, Tuple

import jax
import jax.numpy as jnp
from jax.experimental import pallas as pl
from jax.experimental.pallas import tpu as pltpu

NEG_SLOPE = 0.01  # torch.nn.LeakyReLU default negative_slope


# ----------------------------------------------------------------------------
# Static network configuration (never passed through jit as array leaves)
# ----------------------------------------------------------------------------
class BlockMeta(NamedTuple):
    dilation: int
    c_in: int
    c_out: int
    has_res: bool          # 1x1 conv residual iff c_in != c_out


class NetMeta(NamedTuple):
    kernel_size: int
    in_channels: int
    out_channels: int
    blocks: Tuple[BlockMeta, ...]
    compute_dtype: str = "float32"   # "bfloat16" recommended on v6e/v7x


def make_net_meta(in_channels, channels, depth, out_channels, kernel_size,
                  compute_dtype="float32"):
    blocks = []
    dilation = 1
    for i in range(depth):
        cin = in_channels if i == 0 else channels
        blocks.append(BlockMeta(dilation, cin, channels, cin != channels))
        dilation *= 2
    blocks.append(BlockMeta(dilation, channels, out_channels,
                            channels != out_channels))
    return NetMeta(kernel_size, in_channels, out_channels, tuple(blocks),
                   compute_dtype)


def _round_up(x, m):
    return (x + m - 1) // m * m


# ----------------------------------------------------------------------------
# Fused Pallas kernel: all CausalConvolutionBlocks in one pass
# ----------------------------------------------------------------------------
def _make_fused_kernel(meta: NetMeta, TB: int, Lp: int, Cp: int):
    K = meta.kernel_size
    cdt = jnp.dtype(meta.compute_dtype)

    def leaky(h):
        # maximum(h, a*h) == LeakyReLU(h) for 0 < a < 1 (avoids compare+select)
        return jnp.maximum(h, NEG_SLOPE * h)

    def causal_conv(h3, w_ref, b_ref, d):
        # h3: (TB, Lp, Cp) f32 value, channels-last, per-sequence time axis.
        # out[t] = b + sum_k W[k] @ x[t - (K-1-k)*d]   (zeros for t < shift)
        pad = (K - 1) * d
        hp = jnp.concatenate(
            [jnp.zeros((TB, pad, Cp), h3.dtype), h3], axis=1)       # (TB, Lp+pad, Cp)
        # im2col: tap k reads the contiguous slice hp[:, k*d : k*d+Lp, :]
        cols = jnp.concatenate(
            [hp[:, k * d: k * d + Lp, :] for k in range(K)], axis=-1)   # (TB, Lp, K*Cp)
        y = jnp.dot(cols.reshape(TB * Lp, K * Cp).astype(cdt),
                    w_ref[...].astype(cdt),
                    preferred_element_type=jnp.float32)             # (TB*Lp, Cp)
        y = y + b_ref[...].astype(jnp.float32)                      # (1, Cp) bcast
        return y.reshape(TB, Lp, Cp)

    def kernel(x_ref, *refs):
        o_ref = refs[-1]
        w_refs = refs[:-1]
        h = x_ref[...].astype(jnp.float32)       # (TB, Lp, Cp), stays resident
        idx = 0
        for blk in meta.blocks:
            w1, b1, w2, b2 = w_refs[idx: idx + 4]
            idx += 4
            x_in = h
            t = leaky(causal_conv(x_in, w1, b1, blk.dilation))
            t = leaky(causal_conv(t, w2, b2, blk.dilation))
            if blk.has_res:
                wres, bres = w_refs[idx: idx + 2]
                idx += 2
                r = jnp.dot(x_in.reshape(TB * Lp, Cp).astype(cdt),
                            wres[...].astype(cdt),
                            preferred_element_type=jnp.float32)
                r = (r + bres[...].astype(jnp.float32)).reshape(TB, Lp, Cp)
            else:
                r = x_in                          # identity residual
            h = t + r                             # no final LeakyReLU (final=False)
        o_ref[...] = h.astype(o_ref.dtype)

    return kernel


# ----------------------------------------------------------------------------
# Host-side parameter packing: torch-layout -> lane-padded im2col matrices
# ----------------------------------------------------------------------------
def pack_params(torch_blocks, meta: NetMeta):
    """torch-layout conv weights (O, I, K) -> (K*Cp, Cp) matmul matrices,
    zero-padded so every channel dim is a multiple of 128 (lane-dense)."""
    K = meta.kernel_size
    cmax = max([meta.in_channels, meta.out_channels] +
               [b.c_out for b in meta.blocks])
    Cp = _round_up(cmax, 128)

    def conv_mat(w_oik, b_o):
        cout, cin, _ = w_oik.shape
        m = jnp.zeros((K * Cp, Cp), jnp.float32)
        for k in range(K):
            m = m.at[k * Cp: k * Cp + cin, :cout].set(w_oik[:, :, k].T)
        bias = jnp.zeros((1, Cp), jnp.float32).at[0, :cout].set(b_o)
        return m, bias

    flat = []
    for bp, bm in zip(torch_blocks, meta.blocks):
        w1, b1 = conv_mat(bp["w1"], bp["b1"])
        w2, b2 = conv_mat(bp["w2"], bp["b2"])
        flat += [w1, b1, w2, b2]
        if bm.has_res:
            wres = jnp.zeros((Cp, Cp), jnp.float32)
            wres = wres.at[:bm.c_in, :bm.c_out].set(bp["wres"][:, :, 0].T)
            bres = jnp.zeros((1, Cp), jnp.float32).at[0, :bm.c_out].set(bp["bres"])
            flat += [wres, bres]
    return tuple(flat), Cp


# ----------------------------------------------------------------------------
# Forward wrapper (PyTorch NCL interface)
# ----------------------------------------------------------------------------
def make_causal_cnn_forward(meta: NetMeta, Cp: int):
    @jax.jit
    def forward(x_ncl, flat_weights):
        B, cin, L = x_ncl.shape
        assert cin == meta.in_channels
        Lp = _round_up(L, 8)
        # Batch tile: fold sequences into the matmul M dim (target >= 256 rows),
        # but keep >= 2 grid steps when B allows (feeds v7x's 2 TensorCores).
        TB = max(1, min(B, -(-256 // Lp)))
        if B >= 2:
            TB = min(TB, -(-B // 2))
        Bp = _round_up(B, TB)
        grid = Bp // TB

        # NCL -> channels-last, pad batch / time / channels (zero-padded
        # channels stay exactly zero through the network since the padded
        # weight rows/cols and biases are zero).
        x = jnp.transpose(x_ncl, (0, 2, 1)).astype(jnp.float32)
        x = jnp.pad(x, ((0, Bp - B), (0, Lp - L), (0, Cp - cin)))

        kernel = _make_fused_kernel(meta, TB, Lp, Cp)
        w_specs = [pl.BlockSpec(w.shape, lambda b: (0, 0)) for w in flat_weights]

        # TODO(synk): for very long sequences / big batches, tile over L with a
        # (K-1)*max_dilation halo and raise vmem_limit_bytes; at these shapes
        # everything (weights + activations) fits VMEM trivially.
        out = pl.pallas_call(
            kernel,
            grid=(grid,),
            in_specs=[pl.BlockSpec((TB, Lp, Cp), lambda b: (b, 0, 0))] + w_specs,
            out_specs=pl.BlockSpec((TB, Lp, Cp), lambda b: (b, 0, 0)),
            out_shape=jax.ShapeDtypeStruct((Bp, Lp, Cp), jnp.float32),
            compiler_params=pltpu.CompilerParams(
                dimension_semantics=("parallel",)),
        )(x, *flat_weights)

        out = out[:B, :L, :meta.out_channels]        # drop padding
        return jnp.transpose(out, (0, 2, 1))         # (B, out_channels, L)

    return forward


# ----------------------------------------------------------------------------
# Deterministic torch-layout parameter construction
# ----------------------------------------------------------------------------
def init_params(key, meta: NetMeta, scale=0.3):
    K = meta.kernel_size
    keys = iter(jax.random.split(key, 6 * len(meta.blocks)))

    def nrm(shape):
        return scale * jax.random.normal(next(keys), shape, jnp.float32)

    blocks = []
    for bm in meta.blocks:
        blk = {
            "w1": nrm((bm.c_out, bm.c_in, K)),   # torch Conv1d weight (O, I, K)
            "b1": nrm((bm.c_out,)),
            "w2": nrm((bm.c_out, bm.c_out, K)),
            "b2": nrm((bm.c_out,)),
        }
        if bm.has_res:
            blk["wres"] = nrm((bm.c_out, bm.c_in, 1))   # 1x1 conv
            blk["bres"] = nrm((bm.c_out,))
        blocks.append(blk)
    return blocks


# ----------------------------------------------------------------------------
# Pure-JAX reference (NCL, lax.conv_general_dilated) for validation
# ----------------------------------------------------------------------------
def _ref_conv(x_ncl, w_oik, b, dilation):
    K = w_oik.shape[2]
    pad = (K - 1) * dilation
    y = jax.lax.conv_general_dilated(
        x_ncl, w_oik, window_strides=(1,), padding=[(pad, pad)],
        rhs_dilation=(dilation,), dimension_numbers=("NCH", "OIH", "NCH"))
    y = y[:, :, : x_ncl.shape[2]]                    # Chomp1d
    return y + b[None, :, None]


def ref_forward(x_ncl, torch_blocks, meta: NetMeta):
    x = x_ncl.astype(jnp.float32)
    for bp, bm in zip(torch_blocks, meta.blocks):
        h = _ref_conv(x, bp["w1"], bp["b1"], bm.dilation)
        h = jnp.where(h > 0, h, NEG_SLOPE * h)
        h = _ref_conv(h, bp["w2"], bp["b2"], bm.dilation)
        h = jnp.where(h > 0, h, NEG_SLOPE * h)
        res = _ref_conv(x, bp["wres"], bp["bres"], 1) if bm.has_res else x
        x = h + res
    return x


# ----------------------------------------------------------------------------
if __name__ == "__main__":
    # CausalCNN(in_channels, channels, depth, out_channels, kernel_size)
    in_channels, channels, depth, out_channels, kernel_size = 4, 16, 2, 24, 3
    B, L = 2, 16

    meta = make_net_meta(in_channels, channels, depth, out_channels,
                         kernel_size, compute_dtype="float32")
    key = jax.random.PRNGKey(0)
    kp, kx = jax.random.split(key)
    torch_blocks = init_params(kp, meta)
    x = jax.random.normal(kx, (B, in_channels, L), jnp.float32)   # NCL (like torch)

    flat_weights, Cp = pack_params(torch_blocks, meta)
    forward = make_causal_cnn_forward(meta, Cp)

    out = jax.block_until_ready(forward(x, flat_weights))
    ref = ref_forward(x, torch_blocks, meta)

    assert out.shape == (B, out_channels, L), out.shape
    assert jnp.allclose(out, ref, atol=1e-3, rtol=1e-3), \
        float(jnp.max(jnp.abs(out - ref)))

    # bf16 matmul-input variant (recommended on v6e/v7x) -- smoke run only.
    meta_bf16 = meta._replace(compute_dtype="bfloat16")
    forward_bf16 = make_causal_cnn_forward(meta_bf16, Cp)
    out_bf16 = jax.block_until_ready(forward_bf16(x, flat_weights))
    assert out_bf16.shape == (B, out_channels, L)

    print("KERNEL_OK")
</pallas_src>

<mosaic_0001>
module attributes {stable_mosaic.version = 11 : i64} {
  func.func @kernel(%arg0: i32, %arg1: memref<1x16x128xf32, #tpu.memory_space<vmem>>, %arg2: memref<384x128xf32, #tpu.memory_space<vmem>>, %arg3: memref<1x128xf32, #tpu.memory_space<vmem>>, %arg4: memref<384x128xf32, #tpu.memory_space<vmem>>, %arg5: memref<1x128xf32, #tpu.memory_space<vmem>>, %arg6: memref<128x128xf32, #tpu.memory_space<vmem>>, %arg7: memref<1x128xf32, #tpu.memory_space<vmem>>, %arg8: memref<384x128xf32, #tpu.memory_space<vmem>>, %arg9: memref<1x128xf32, #tpu.memory_space<vmem>>, %arg10: memref<384x128xf32, #tpu.memory_space<vmem>>, %arg11: memref<1x128xf32, #tpu.memory_space<vmem>>, %arg12: memref<384x128xf32, #tpu.memory_space<vmem>>, %arg13: memref<1x128xf32, #tpu.memory_space<vmem>>, %arg14: memref<384x128xf32, #tpu.memory_space<vmem>>, %arg15: memref<1x128xf32, #tpu.memory_space<vmem>>, %arg16: memref<128x128xf32, #tpu.memory_space<vmem>>, %arg17: memref<1x128xf32, #tpu.memory_space<vmem>>, %arg18: memref<1x16x128xf32, #tpu.memory_space<vmem>>) attributes {dimension_semantics = [#tpu.dimension_semantics<parallel>], iteration_bounds = array<i64: 2>, scalar_prefetch = 0 : i64, scratch_operands = 0 : i64, tpu.core_type = #tpu.core_type<tc>, window_params = [{transform_indices = @transform_0, window_bounds = array<i64: 1, 16, 128>}, {pipeline_mode = #tpu.pipeline_mode<synchronous>, transform_indices = @transform_1, window_bounds = array<i64: 384, 128>}, {pipeline_mode = #tpu.pipeline_mode<synchronous>, transform_indices = @transform_2, window_bounds = array<i64: 1, 128>}, {pipeline_mode = #tpu.pipeline_mode<synchronous>, transform_indices = @transform_3, window_bounds = array<i64: 384, 128>}, {pipeline_mode = #tpu.pipeline_mode<synchronous>, transform_indices = @transform_4, window_bounds = array<i64: 1, 128>}, {pipeline_mode = #tpu.pipeline_mode<synchronous>, transform_indices = @transform_5, window_bounds = array<i64: 128, 128>}, {pipeline_mode = #tpu.pipeline_mode<synchronous>, transform_indices = @transform_6, window_bounds = array<i64: 1, 128>}, {pipeline_mode = #tpu.pipeline_mode<synchronous>, transform_indices = @transform_7, window_bounds = array<i64: 384, 128>}, {pipeline_mode = #tpu.pipeline_mode<synchronous>, transform_indices = @transform_8, window_bounds = array<i64: 1, 128>}, {pipeline_mode = #tpu.pipeline_mode<synchronous>, transform_indices = @transform_9, window_bounds = array<i64: 384, 128>}, {pipeline_mode = #tpu.pipeline_mode<synchronous>, transform_indices = @transform_10, window_bounds = array<i64: 1, 128>}, {pipeline_mode = #tpu.pipeline_mode<synchronous>, transform_indices = @transform_11, window_bounds = array<i64: 384, 128>}, {pipeline_mode = #tpu.pipeline_mode<synchronous>, transform_indices = @transform_12, window_bounds = array<i64: 1, 128>}, {pipeline_mode = #tpu.pipeline_mode<synchronous>, transform_indices = @transform_13, window_bounds = array<i64: 384, 128>}, {pipeline_mode = #tpu.pipeline_mode<synchronous>, transform_indices = @transform_14, window_bounds = array<i64: 1, 128>}, {pipeline_mode = #tpu.pipeline_mode<synchronous>, transform_indices = @transform_15, window_bounds = array<i64: 128, 128>}, {pipeline_mode = #tpu.pipeline_mode<synchronous>, transform_indices = @transform_16, window_bounds = array<i64: 1, 128>}, {transform_indices = @transform_17, window_bounds = array<i64: 1, 16, 128>}]} {
    %c0 = arith.constant 0 : index
    %c0_0 = arith.constant 0 : index
    %c0_1 = arith.constant 0 : index
    %0 = vector.load %arg1[%c0, %c0_0, %c0_1] : memref<1x16x128xf32, #tpu.memory_space<vmem>>, vector<1x16x128xf32>
    %cst = arith.constant 0.000000e+00 : f32
    %1 = vector.broadcast %cst : f32 to vector<1x2x128xf32>
    %2 = tpu.concatenate %1, %0 in 1 : vector<1x2x128xf32>, vector<1x16x128xf32> -> vector<1x18x128xf32>
    %3 = vector.extract_strided_slice %2 {offsets = [0, 0, 0], sizes = [1, 16, 128], strides = [1, 1, 1]} : vector<1x18x128xf32> to vector<1x16x128xf32>
    %4 = vector.extract_strided_slice %2 {offsets = [0, 1, 0], sizes = [1, 16, 128], strides = [1, 1, 1]} : vector<1x18x128xf32> to vector<1x16x128xf32>
    %5 = vector.extract_strided_slice %2 {offsets = [0, 2, 0], sizes = [1, 16, 128], strides = [1, 1, 1]} : vector<1x18x128xf32> to vector<1x16x128xf32>
    %6 = tpu.concatenate %3, %4, %5 in 2 : vector<1x16x128xf32>, vector<1x16x128xf32>, vector<1x16x128xf32> -> vector<1x16x384xf32>
    %7 = vector.shape_cast %6 : vector<1x16x384xf32> to vector<16x384xf32>
    %c0_2 = arith.constant 0 : index
    %c0_3 = arith.constant 0 : index
    %8 = vector.load %arg2[%c0_2, %c0_3] : memref<384x128xf32, #tpu.memory_space<vmem>>, vector<384x128xf32>
    %cst_4 = arith.constant dense<0.000000e+00> : vector<16x128xf32>
    %9 = tpu.matmul %7, %8, %cst_4 {dimension_numbers = #tpu.dot_dimension_numbers<[1], [0], [0], [1], [0, 0, 1, 1], [], []>} : vector<16x384xf32>, vector<384x128xf32>, vector<16x128xf32> -> vector<16x128xf32>
    %c0_5 = arith.constant 0 : index
    %c0_6 = arith.constant 0 : index
    %10 = vector.load %arg3[%c0_5, %c0_6] : memref<1x128xf32, #tpu.memory_space<vmem>>, vector<1x128xf32>
    %11 = vector.broadcast %10 : vector<1x128xf32> to vector<16x128xf32>
    %12 = arith.addf %9, %11 : vector<16x128xf32>
    %13 = vector.shape_cast %12 : vector<16x128xf32> to vector<1x16x128xf32>
    %cst_7 = arith.constant 0.00999999977 : f32
    %14 = vector.broadcast %cst_7 : f32 to vector<1x16x128xf32>
    %15 = arith.mulf %14, %13 : vector<1x16x128xf32>
    %16 = arith.maximumf %13, %15 : vector<1x16x128xf32>
    %cst_8 = arith.constant 0.000000e+00 : f32
    %17 = vector.broadcast %cst_8 : f32 to vector<1x2x128xf32>
    %18 = tpu.concatenate %17, %16 in 1 : vector<1x2x128xf32>, vector<1x16x128xf32> -> vector<1x18x128xf32>
    %19 = vector.extract_strided_slice %18 {offsets = [0, 0, 0], sizes = [1, 16, 128], strides = [1, 1, 1]} : vector<1x18x128xf32> to vector<1x16x128xf32>
    %20 = vector.extract_strided_slice %18 {offsets = [0, 1, 0], sizes = [1, 16, 128], strides = [1, 1, 1]} : vector<1x18x128xf32> to vector<1x16x128xf32>
    %21 = vector.extract_strided_slice %18 {offsets = [0, 2, 0], sizes = [1, 16, 128], strides = [1, 1, 1]} : vector<1x18x128xf32> to vector<1x16x128xf32>
    %22 = tpu.concatenate %19, %20, %21 in 2 : vector<1x16x128xf32>, vector<1x16x128xf32>, vector<1x16x128xf32> -> vector<1x16x384xf32>
    %23 = vector.shape_cast %22 : vector<1x16x384xf32> to vector<16x384xf32>
    %c0_9 = arith.constant 0 : index
    %c0_10 = arith.constant 0 : index
    %24 = vector.load %arg4[%c0_9, %c0_10] : memref<384x128xf32, #tpu.memory_space<vmem>>, vector<384x128xf32>
    %cst_11 = arith.constant dense<0.000000e+00> : vector<16x128xf32>
    %25 = tpu.matmul %23, %24, %cst_11 {dimension_numbers = #tpu.dot_dimension_numbers<[1], [0], [0], [1], [0, 0, 1, 1], [], []>} : vector<16x384xf32>, vector<384x128xf32>, vector<16x128xf32> -> vector<16x128xf32>
    %c0_12 = arith.constant 0 : index
    %c0_13 = arith.constant 0 : index
    %26 = vector.load %arg5[%c0_12, %c0_13] : memref<1x128xf32, #tpu.memory_space<vmem>>, vector<1x128xf32>
    %27 = vector.broadcast %26 : vector<1x128xf32> to vector<16x128xf32>
    %28 = arith.addf %25, %27 : vector<16x128xf32>
    %29 = vector.shape_cast %28 : vector<16x128xf32> to vector<1x16x128xf32>
    %cst_14 = arith.constant 0.00999999977 : f32
    %30 = vector.broadcast %cst_14 : f32 to vector<1x16x128xf32>
    %31 = arith.mulf %30, %29 : vector<1x16x128xf32>
    %32 = arith.maximumf %29, %31 : vector<1x16x128xf32>
    %33 = vector.shape_cast %0 : vector<1x16x128xf32> to vector<16x128xf32>
    %c0_15 = arith.constant 0 : index
    %c0_16 = arith.constant 0 : index
    %34 = vector.load %arg6[%c0_15, %c0_16] : memref<128x128xf32, #tpu.memory_space<vmem>>, vector<128x128xf32>
    %cst_17 = arith.constant dense<0.000000e+00> : vector<16x128xf32>
    %35 = tpu.matmul %33, %34, %cst_17 {dimension_numbers = #tpu.dot_dimension_numbers<[1], [0], [0], [1], [0, 0, 1, 1], [], []>} : vector<16x128xf32>, vector<128x128xf32>, vector<16x128xf32> -> vector<16x128xf32>
    %c0_18 = arith.constant 0 : index
    %c0_19 = arith.constant 0 : index
    %36 = vector.load %arg7[%c0_18, %c0_19] : memref<1x128xf32, #tpu.memory_space<vmem>>, vector<1x128xf32>
    %37 = vector.broadcast %36 : vector<1x128xf32> to vector<16x128xf32>
    %38 = arith.addf %35, %37 : vector<16x128xf32>
    %39 = vector.shape_cast %38 : vector<16x128xf32> to vector<1x16x128xf32>
    %40 = arith.addf %32, %39 : vector<1x16x128xf32>
    %cst_20 = arith.constant 0.000000e+00 : f32
    %41 = vector.broadcast %cst_20 : f32 to vector<1x4x128xf32>
    %42 = tpu.concatenate %41, %40 in 1 : vector<1x4x128xf32>, vector<1x16x128xf32> -> vector<1x20x128xf32>
    %43 = vector.extract_strided_slice %42 {offsets = [0, 0, 0], sizes = [1, 16, 128], strides = [1, 1, 1]} : vector<1x20x128xf32> to vector<1x16x128xf32>
    %44 = vector.extract_strided_slice %42 {offsets = [0, 2, 0], sizes = [1, 16, 128], strides = [1, 1, 1]} : vector<1x20x128xf32> to vector<1x16x128xf32>
    %45 = vector.extract_strided_slice %42 {offsets = [0, 4, 0], sizes = [1, 16, 128], strides = [1, 1, 1]} : vector<1x20x128xf32> to vector<1x16x128xf32>
    %46 = tpu.concatenate %43, %44, %45 in 2 : vector<1x16x128xf32>, vector<1x16x128xf32>, vector<1x16x128xf32> -> vector<1x16x384xf32>
    %47 = vector.shape_cast %46 : vector<1x16x384xf32> to vector<16x384xf32>
    %c0_21 = arith.constant 0 : index
    %c0_22 = arith.constant 0 : index
    %48 = vector.load %arg8[%c0_21, %c0_22] : memref<384x128xf32, #tpu.memory_space<vmem>>, vector<384x128xf32>
    %cst_23 = arith.constant dense<0.000000e+00> : vector<16x128xf32>
    %49 = tpu.matmul %47, %48, %cst_23 {dimension_numbers = #tpu.dot_dimension_numbers<[1], [0], [0], [1], [0, 0, 1, 1], [], []>} : vector<16x384xf32>, vector<384x128xf32>, vector<16x128xf32> -> vector<16x128xf32>
    %c0_24 = arith.constant 0 : index
    %c0_25 = arith.constant 0 : index
    %50 = vector.load %arg9[%c0_24, %c0_25] : memref<1x128xf32, #tpu.memory_space<vmem>>, vector<1x128xf32>
    %51 = vector.broadcast %50 : vector<1x128xf32> to vector<16x128xf32>
    %52 = arith.addf %49, %51 : vector<16x128xf32>
    %53 = vector.shape_cast %52 : vector<16x128xf32> to vector<1x16x128xf32>
    %cst_26 = arith.constant 0.00999999977 : f32
    %54 = vector.broadcast %cst_26 : f32 to vector<1x16x128xf32>
    %55 = arith.mulf %54, %53 : vector<1x16x128xf32>
    %56 = arith.maximumf %53, %55 : vector<1x16x128xf32>
    %cst_27 = arith.constant 0.000000e+00 : f32
    %57 = vector.broadcast %cst_27 : f32 to vector<1x4x128xf32>
    %58 = tpu.concatenate %57, %56 in 1 : vector<1x4x128xf32>, vector<1x16x128xf32> -> vector<1x20x128xf32>
    %59 = vector.extract_strided_slice %58 {offsets = [0, 0, 0], sizes = [1, 16, 128], strides = [1, 1, 1]} : vector<1x20x128xf32> to vector<1x16x128xf32>
    %60 = vector.extract_strided_slice %58 {offsets = [0, 2, 0], sizes = [1, 16, 128], strides = [1, 1, 1]} : vector<1x20x128xf32> to vector<1x16x128xf32>
    %61 = vector.extract_strided_slice %58 {offsets = [0, 4, 0], sizes = [1, 16, 128], strides = [1, 1, 1]} : vector<1x20x128xf32> to vector<1x16x128xf32>
    %62 = tpu.concatenate %59, %60, %61 in 2 : vector<1x16x128xf32>, vector<1x16x128xf32>, vector<1x16x128xf32> -> vector<1x16x384xf32>
    %63 = vector.shape_cast %62 : vector<1x16x384xf32> to vector<16x384xf32>
    %c0_28 = arith.constant 0 : index
    %c0_29 = arith.constant 0 : index
    %64 = vector.load %arg10[%c0_28, %c0_29] : memref<384x128xf32, #tpu.memory_space<vmem>>, vector<384x128xf32>
    %cst_30 = arith.constant dense<0.000000e+00> : vector<16x128xf32>
    %65 = tpu.matmul %63, %64, %cst_30 {dimension_numbers = #tpu.dot_dimension_numbers<[1], [0], [0], [1], [0, 0, 1, 1], [], []>} : vector<16x384xf32>, vector<384x128xf32>, vector<16x128xf32> -> vector<16x128xf32>
    %c0_31 = arith.constant 0 : index
    %c0_32 = arith.constant 0 : index
    %66 = vector.load %arg11[%c0_31, %c0_32] : memref<1x128xf32, #tpu.memory_space<vmem>>, vector<1x128xf32>
    %67 = vector.broadcast %66 : vector<1x128xf32> to vector<16x128xf32>
    %68 = arith.addf %65, %67 : vector<16x128xf32>
    %69 = vector.shape_cast %68 : vector<16x128xf32> to vector<1x16x128xf32>
    %cst_33 = arith.constant 0.00999999977 : f32
    %70 = vector.broadcast %cst_33 : f32 to vector<1x16x128xf32>
    %71 = arith.mulf %70, %69 : vector<1x16x128xf32>
    %72 = arith.maximumf %69, %71 : vector<1x16x128xf32>
    %73 = arith.addf %72, %40 : vector<1x16x128xf32>
    %cst_34 = arith.constant 0.000000e+00 : f32
    %74 = vector.broadcast %cst_34 : f32 to vector<1x8x128xf32>
    %75 = tpu.concatenate %74, %73 in 1 : vector<1x8x128xf32>, vector<1x16x128xf32> -> vector<1x24x128xf32>
    %76 = vector.extract_strided_slice %75 {offsets = [0, 0, 0], sizes = [1, 16, 128], strides = [1, 1, 1]} : vector<1x24x128xf32> to vector<1x16x128xf32>
    %77 = vector.extract_strided_slice %75 {offsets = [0, 4, 0], sizes = [1, 16, 128], strides = [1, 1, 1]} : vector<1x24x128xf32> to vector<1x16x128xf32>
    %78 = vector.extract_strided_slice %75 {offsets = [0, 8, 0], sizes = [1, 16, 128], strides = [1, 1, 1]} : vector<1x24x128xf32> to vector<1x16x128xf32>
    %79 = tpu.concatenate %76, %77, %78 in 2 : vector<1x16x128xf32>, vector<1x16x128xf32>, vector<1x16x128xf32> -> vector<1x16x384xf32>
    %80 = vector.shape_cast %79 : vector<1x16x384xf32> to vector<16x384xf32>
    %c0_35 = arith.constant 0 : index
    %c0_36 = arith.constant 0 : index
    %81 = vector.load %arg12[%c0_35, %c0_36] : memref<384x128xf32, #tpu.memory_space<vmem>>, vector<384x128xf32>
    %cst_37 = arith.constant dense<0.000000e+00> : vector<16x128xf32>
    %82 = tpu.matmul %80, %81, %cst_37 {dimension_numbers = #tpu.dot_dimension_numbers<[1], [0], [0], [1], [0, 0, 1, 1], [], []>} : vector<16x384xf32>, vector<384x128xf32>, vector<16x128xf32> -> vector<16x128xf32>
    %c0_38 = arith.constant 0 : index
    %c0_39 = arith.constant 0 : index
    %83 = vector.load %arg13[%c0_38, %c0_39] : memref<1x128xf32, #tpu.memory_space<vmem>>, vector<1x128xf32>
    %84 = vector.broadcast %83 : vector<1x128xf32> to vector<16x128xf32>
    %85 = arith.addf %82, %84 : vector<16x128xf32>
    %86 = vector.shape_cast %85 : vector<16x128xf32> to vector<1x16x128xf32>
    %cst_40 = arith.constant 0.00999999977 : f32
    %87 = vector.broadcast %cst_40 : f32 to vector<1x16x128xf32>
    %88 = arith.mulf %87, %86 : vector<1x16x128xf32>
    %89 = arith.maximumf %86, %88 : vector<1x16x128xf32>
    %cst_41 = arith.constant 0.000000e+00 : f32
    %90 = vector.broadcast %cst_41 : f32 to vector<1x8x128xf32>
    %91 = tpu.concatenate %90, %89 in 1 : vector<1x8x128xf32>, vector<1x16x128xf32> -> vector<1x24x128xf32>
    %92 = vector.extract_strided_slice %91 {offsets = [0, 0, 0], sizes = [1, 16, 128], strides = [1, 1, 1]} : vector<1x24x128xf32> to vector<1x16x128xf32>
    %93 = vector.extract_strided_slice %91 {offsets = [0, 4, 0], sizes = [1, 16, 128], strides = [1, 1, 1]} : vector<1x24x128xf32> to vector<1x16x128xf32>
    %94 = vector.extract_strided_slice %91 {offsets = [0, 8, 0], sizes = [1, 16, 128], strides = [1, 1, 1]} : vector<1x24x128xf32> to vector<1x16x128xf32>
    %95 = tpu.concatenate %92, %93, %94 in 2 : vector<1x16x128xf32>, vector<1x16x128xf32>, vector<1x16x128xf32> -> vector<1x16x384xf32>
    %96 = vector.shape_cast %95 : vector<1x16x384xf32> to vector<16x384xf32>
    %c0_42 = arith.constant 0 : index
    %c0_43 = arith.constant 0 : index
    %97 = vector.load %arg14[%c0_42, %c0_43] : memref<384x128xf32, #tpu.memory_space<vmem>>, vector<384x128xf32>
    %cst_44 = arith.constant dense<0.000000e+00> : vector<16x128xf32>
    %98 = tpu.matmul %96, %97, %cst_44 {dimension_numbers = #tpu.dot_dimension_numbers<[1], [0], [0], [1], [0, 0, 1, 1], [], []>} : vector<16x384xf32>, vector<384x128xf32>, vector<16x128xf32> -> vector<16x128xf32>
    %c0_45 = arith.constant 0 : index
    %c0_46 = arith.constant 0 : index
    %99 = vector.load %arg15[%c0_45, %c0_46] : memref<1x128xf32, #tpu.memory_space<vmem>>, vector<1x128xf32>
    %100 = vector.broadcast %99 : vector<1x128xf32> to vector<16x128xf32>
    %101 = arith.addf %98, %100 : vector<16x128xf32>
    %102 = vector.shape_cast %101 : vector<16x128xf32> to vector<1x16x128xf32>
    %cst_47 = arith.constant 0.00999999977 : f32
    %103 = vector.broadcast %cst_47 : f32 to vector<1x16x128xf32>
    %104 = arith.mulf %103, %102 : vector<1x16x128xf32>
    %105 = arith.maximumf %102, %104 : vector<1x16x128xf32>
    %106 = vector.shape_cast %73 : vector<1x16x128xf32> to vector<16x128xf32>
    %c0_48 = arith.constant 0 : index
    %c0_49 = arith.constant 0 : index
    %107 = vector.load %arg16[%c0_48, %c0_49] : memref<128x128xf32, #tpu.memory_space<vmem>>, vector<128x128xf32>
    %cst_50 = arith.constant dense<0.000000e+00> : vector<16x128xf32>
    %108 = tpu.matmul %106, %107, %cst_50 {dimension_numbers = #tpu.dot_dimension_numbers<[1], [0], [0], [1], [0, 0, 1, 1], [], []>} : vector<16x128xf32>, vector<128x128xf32>, vector<16x128xf32> -> vector<16x128xf32>
    %c0_51 = arith.constant 0 : index
    %c0_52 = arith.constant 0 : index
    %109 = vector.load %arg17[%c0_51, %c0_52] : memref<1x128xf32, #tpu.memory_space<vmem>>, vector<1x128xf32>
    %110 = vector.broadcast %109 : vector<1x128xf32> to vector<16x128xf32>
    %111 = arith.addf %108, %110 : vector<16x128xf32>
    %112 = vector.shape_cast %111 : vector<16x128xf32> to vector<1x16x128xf32>
    %113 = arith.addf %105, %112 : vector<1x16x128xf32>
    %c0_53 = arith.constant 0 : index
    %c0_54 = arith.constant 0 : index
    %c0_55 = arith.constant 0 : index
    %114 = vector.load %arg18[%c0_53, %c0_54, %c0_55] : memref<1x16x128xf32, #tpu.memory_space<vmem>>, vector<1x16x128xf32>
    tpu.vector_store %arg18[%c0_53, %c0_54, %c0_55], %113 {strides = array<i32>} : memref<1x16x128xf32, #tpu.memory_space<vmem>>, vector<1x16x128xf32>,
    return
  }
  func.func @transform_0(%arg0: i32) -> (i32, i32, i32) {
    %c0_i32 = arith.constant 0 : i32
    %c0_i32_0 = arith.constant 0 : i32
    %c0_i32_1 = arith.constant 0 : i32
    return %arg0, %c0_i32, %c0_i32_0 : i32, i32, i32
  }
  func.func @transform_1(%arg0: i32) -> (i32, i32) {
    %c0_i32 = arith.constant 0 : i32
    %c0_i32_0 = arith.constant 0 : i32
    %c0_i32_1 = arith.constant 0 : i32
    return %c0_i32, %c0_i32_0 : i32, i32
  }
  func.func @transform_2(%arg0: i32) -> (i32, i32) {
    %c0_i32 = arith.constant 0 : i32
    %c0_i32_0 = arith.constant 0 : i32
    %c0_i32_1 = arith.constant 0 : i32
    return %c0_i32, %c0_i32_0 : i32, i32
  }
  func.func @transform_3(%arg0: i32) -> (i32, i32) {
    %c0_i32 = arith.constant 0 : i32
    %c0_i32_0 = arith.constant 0 : i32
    %c0_i32_1 = arith.constant 0 : i32
    return %c0_i32, %c0_i32_0 : i32, i32
  }
  func.func @transform_4(%arg0: i32) -> (i32, i32) {
    %c0_i32 = arith.constant 0 : i32
    %c0_i32_0 = arith.constant 0 : i32
    %c0_i32_1 = arith.constant 0 : i32
    return %c0_i32, %c0_i32_0 : i32, i32
  }
  func.func @transform_5(%arg0: i32) -> (i32, i32) {
    %c0_i32 = arith.constant 0 : i32
    %c0_i32_0 = arith.constant 0 : i32
    %c0_i32_1 = arith.constant 0 : i32
    return %c0_i32, %c0_i32_0 : i32, i32
  }
  func.func @transform_6(%arg0: i32) -> (i32, i32) {
    %c0_i32 = arith.constant 0 : i32
    %c0_i32_0 = arith.constant 0 : i32
    %c0_i32_1 = arith.constant 0 : i32
    return %c0_i32, %c0_i32_0 : i32, i32
  }
  func.func @transform_7(%arg0: i32) -> (i32, i32) {
    %c0_i32 = arith.constant 0 : i32
    %c0_i32_0 = arith.constant 0 : i32
    %c0_i32_1 = arith.constant 0 : i32
    return %c0_i32, %c0_i32_0 : i32, i32
  }
  func.func @transform_8(%arg0: i32) -> (i32, i32) {
    %c0_i32 = arith.constant 0 : i32
    %c0_i32_0 = arith.constant 0 : i32
    %c0_i32_1 = arith.constant 0 : i32
    return %c0_i32, %c0_i32_0 : i32, i32
  }
  func.func @transform_9(%arg0: i32) -> (i32, i32) {
    %c0_i32 = arith.constant 0 : i32
    %c0_i32_0 = arith.constant 0 : i32
    %c0_i32_1 = arith.constant 0 : i32
    return %c0_i32, %c0_i32_0 : i32, i32
  }
  func.func @transform_10(%arg0: i32) -> (i32, i32) {
    %c0_i32 = arith.constant 0 : i32
    %c0_i32_0 = arith.constant 0 : i32
    %c0_i32_1 = arith.constant 0 : i32
    return %c0_i32, %c0_i32_0 : i32, i32
  }
  func.func @transform_11(%arg0: i32) -> (i32, i32) {
    %c0_i32 = arith.constant 0 : i32
    %c0_i32_0 = arith.constant 0 : i32
    %c0_i32_1 = arith.constant 0 : i32
    return %c0_i32, %c0_i32_0 : i32, i32
  }
  func.func @transform_12(%arg0: i32) -> (i32, i32) {
    %c0_i32 = arith.constant 0 : i32
    %c0_i32_0 = arith.constant 0 : i32
    %c0_i32_1 = arith.constant 0 : i32
    return %c0_i32, %c0_i32_0 : i32, i32
  }
  func.func @transform_13(%arg0: i32) -> (i32, i32) {
    %c0_i32 = arith.constant 0 : i32
    %c0_i32_0 = arith.constant 0 : i32
    %c0_i32_1 = arith.constant 0 : i32
    return %c0_i32, %c0_i32_0 : i32, i32
  }
  func.func @transform_14(%arg0: i32) -> (i32, i32) {
    %c0_i32 = arith.constant 0 : i32
    %c0_i32_0 = arith.constant 0 : i32
    %c0_i32_1 = arith.constant 0 : i32
    return %c0_i32, %c0_i32_0 : i32, i32
  }
  func.func @transform_15(%arg0: i32) -> (i32, i32) {
    %c0_i32 = arith.constant 0 : i32
    %c0_i32_0 = arith.constant 0 : i32
    %c0_i32_1 = arith.constant 0 : i32
    return %c0_i32, %c0_i32_0 : i32, i32
  }
  func.func @transform_16(%arg0: i32) -> (i32, i32) {
    %c0_i32 = arith.constant 0 : i32
    %c0_i32_0 = arith.constant 0 : i32
    %c0_i32_1 = arith.constant 0 : i32
    return %c0_i32, %c0_i32_0 : i32, i32
  }
  func.func @transform_17(%arg0: i32) -> (i32, i32, i32) {
    %c0_i32 = arith.constant 0 : i32
    %c0_i32_0 = arith.constant 0 : i32
    %c0_i32_1 = arith.constant 0 : i32
    return %arg0, %c0_i32, %c0_i32_0 : i32, i32, i32
  }
}

</mosaic_0001>

<bundles_post_ra>
// kernel: forward.1
= control target key start
LH: loop header
LB: loop body
LE: loop exit
PB: predicated region body
PF: predicated region fallthrough
CT: control target
= control target key end

     0   :  { %s4303_s0 = inlined_call_operand.vmem [shape: f32[2,16,128], index: 0, kind: input, shape index: {}]   ;;  %s4304_s1 = inlined_call_operand.hbm [shape: f32[384,128], index: 1, kind: input, shape index: {}]   ;;  %s4305_s2 = inlined_call_operand.vmem [shape: f32[1,128], index: 2, kind: input, shape index: {}]   ;;  %s4306_s3 = inlined_call_operand.hbm [shape: f32[384,128], index: 3, kind: input, shape index: {}]   ;;  %s4307_s4 = inlined_call_operand.vmem [shape: f32[1,128], index: 4, kind: input, shape index: {}]   ;;  %s4308_s5 = inlined_call_operand.hbm [shape: f32[128,128], index: 5, kind: input, shape index: {}]   ;;  %s4309_s6 = inlined_call_operand.vmem [shape: f32[1,128], index: 6, kind: input, shape index: {}]   ;;  %s4310_s7 = inlined_call_operand.hbm [shape: f32[384,128], index: 7, kind: input, shape index: {}]   ;;  %s4311_s8 = inlined_call_operand.vmem [shape: f32[1,128], index: 8, kind: input, shape index: {}]   ;;  %s4312_s9 = inlined_call_operand.hbm [shape: f32[384,128], index: 9, kind: input, shape index: {}]   ;;  %s4313_s10 = inlined_call_operand.vmem [shape: f32[1,128], index: 10, kind: input, shape index: {}]   ;;  %s4314_s11 = inlined_call_operand.hbm [shape: f32[384,128], index: 11, kind: input, shape index: {}]   ;;  %s4315_s12 = inlined_call_operand.vmem [shape: f32[1,128], index: 12, kind: input, shape index: {}]   ;;  %s4316_s13 = inlined_call_operand.hbm [shape: f32[384,128], index: 13, kind: input, shape index: {}]   ;;  %s4317_s14 = inlined_call_operand.vmem [shape: f32[1,128], index: 14, kind: input, shape index: {}]   ;;  %s4318_s15 = inlined_call_operand.vmem [shape: f32[128,128], index: 15, kind: input, shape index: {}]   ;;  %s4319_s16 = inlined_call_operand.vmem [shape: f32[1,128], index: 16, kind: input, shape index: {}]   ;;  %s4320_s17 = inlined_call_operand.vmem [shape: f32[2,16,128], index: 17, kind: output, shape index: {}]  }
   0x1   :  { %4325 = sst [smem:[#allocation18_spill]] %s4303_s0 }
   0x2   :  { %4326 = sst [smem:[#allocation19_spill]] %s4304_s1 }
   0x3   :  { %4327 = sst [smem:[#allocation20_spill]] %s4306_s3 }
   0x4   :  { %4328 = sst [smem:[#allocation21_spill]] %s4315_s12 }
   0x5   :  { %4329 = sst [smem:[#allocation22_spill]] %s4317_s14 }
   0x6   :  { %4330 = sst [smem:[#allocation23_spill]] %s4319_s16 }
   0x7   :  { %4331 = sst [smem:[#allocation24_spill]] %s4320_s17 }
   0x8   :  { %22 = vsyncpa [#allocation3], 0 }
   0x9   :  { %23 = vsyncpa [#allocation5], 0 }
   0xa   :  { %24 = vsyncpa [#allocation8], 0 }
   0xb   :  { %25 = vsyncpa [#allocation11], 0  ;;  %s3894_s24 = smov 0  }
   0xc LB: > { %4332 = sst [smem:[#allocation17_spill]] %s3792_s24  ;;  %s3900_s25 = sadd.s32 4294967295, %s3792_s24   ;;  %s3792_s24 = sphi %s3894_s24, %s31_s24  }
   0xd   : > { %p2351_p0 = scmp.ge.s32.totalorder %s3792_s24, 1  ;;  %p424_p1 = scmp.lt.s32.totalorder %s3792_s24, 3 }
   0xe   : > { %p4323_p2 = scmp.eq.s32.totalorder %s3900_s25, 0  ;;  %s3794_s27 = smov [#allocation4]  }
   0xf   : > { %p3905_p3 = pnand %p2351_p0, %p424_p1  ;;  %s452_s28 = sshll.u32 %s3794_s27, 4  ;;  %s3909_s28 = int_to_ptr.vmem [resolvable:$true] %s452_s28 }
  0x10   : > { %s3795_s29 = smov [#allocation7]   ;;  %s3796_s18 = smov [#allocation10]  }
  0x11   : > { %s4333_s26 = scalar_select %p3905_p3, 1, 0 }
  0x12   : > { %p3520_p4 = pneg %p3905_p3  ;;  %s484_s0 = sshll.u32 %s3795_s29, 4  ;;  %s3913_s0 = int_to_ptr.vmem [resolvable:$true] %s484_s0 }
  0x13   : > { %s516_s19 = sshll.u32 %s3796_s18, 4  ;;  %s3797_s1 = smov [#allocation2]   ;;  %s3921_s19 = int_to_ptr.vmem [resolvable:$true] %s516_s19 }
  0x14   : > { %p3917_p5 = pnand %p4323_p2, %p3520_p4  ;;  %s3923_s20 = sshll.u32 %s3797_s1, 4  ;;  %s437_s20 = int_to_ptr.vmem [resolvable:$true] %s3923_s20 }
  0x15   : > { %s4335_s3 = sld [smem:[#allocation20_spill]] }
  0x16   : > { %p3933_p7 = pneg %p3917_p5 }
  0x1b   : > { %s3574_s23 = scalar_lea.hbm %s4335_s3, 6144 }
  0x1c   : > { %p3575_p6 = scmp.ne.s32.totalorder %s4335_s3, %s3574_s23  ;;  %p3581_p10 = scmp.lt.u32.totalorder %s3574_s23, %s4335_s3 }
  0x1e   : > { %p3577_p8 = pnand %p3933_p7, %p3575_p6 }
  0x20   : > { %p3578_p9 = pneg %p3577_p8 }
  0x22   : > { %p3583_p11 = pnand %p3581_p10, %p3578_p9 }
  0x24   : > { %3586 = shalt.err (!%p3583_p11)
}
  0x25   : > { %s3587_s21 = scalar_lea.vmem %s3909_s28, 6144  ;;  %p3595_p1 = scmp.lt.s32.totalorder %s3909_s28, %s3909_s28 }
  0x26   : > { %p3588_p12 = scmp.ne.s32.totalorder %s3909_s28, %s3587_s21  ;;  %p3596_p4 = scmp.lt.s32.totalorder %s3587_s21, %s3587_s21 }
  0x28   : > { %p3590_p13 = pnand %p3588_p12, %p3933_p7  ;;  %p3597_p6 = por %p3596_p4, %p3595_p1 }
  0x2a   : > { %p3591_p0 = pneg %p3590_p13 }
  0x2c   : > { %p3598_p8 = pnand %p3597_p6, %p3591_p0 }
  0x2e   : > { %3601 = shalt.err (!%p3598_p8)
}
  0x2f   : > { %s3798_s22 = smov 128   ;;  %s3799_s23 = smov 8  }
  0x30   : > { %3526 = dma.hbm_to_vmem [thread:$0]  (!%p3917_p5), %s4335_s3, 6144, %s3909_s28, [#allocation5], %s3798_s22, %s3798_s22, %s3799_s23  }
  0x31   : > { %s3602_s21 = scalar_lea.hbm %s4310_s7, 6144 }
  0x32   : > { %p3603_p9 = scmp.ne.s32.totalorder %s4310_s7, %s3602_s21  ;;  %p3609_p12 = scmp.lt.u32.totalorder %s3602_s21, %s4310_s7 }
  0x34   : > { %p3605_p10 = pnand %p3603_p9, %p3933_p7 }
  0x36   : > { %p3606_p11 = pneg %p3605_p10 }
  0x38   : > { %p3611_p13 = pnand %p3609_p12, %p3606_p11 }
  0x3a   : > { %3614 = shalt.err (!%p3611_p13)
}
  0x3b   : > { %s3615_s28 = scalar_lea.vmem %s3913_s0, 6144  ;;  %p3623_p6 = scmp.lt.s32.totalorder %s3913_s0, %s3913_s0 }
  0x3c   : > { %p3616_p0 = scmp.ne.s32.totalorder %s3913_s0, %s3615_s28  ;;  %p3624_p8 = scmp.lt.s32.totalorder %s3615_s28, %s3615_s28 }
  0x3e   : > { %p3618_p1 = pnand %p3616_p0, %p3933_p7  ;;  %p3625_p9 = por %p3624_p8, %p3623_p6 }
  0x40   : > { %p3619_p4 = pneg %p3618_p1 }
  0x42   : > { %p3626_p10 = pnand %p3625_p9, %p3619_p4 }
  0x44   : > { %3629 = shalt.err (!%p3626_p10)
}
  0x45   : > { %3532 = dma.hbm_to_vmem [thread:$0]  (!%p3917_p5), %s4310_s7, 6144, %s3913_s0, [#allocation8], %s3798_s22, %s3798_s22, %s3799_s23  }
  0x46   : > { %s3630_s27 = scalar_lea.hbm %s4314_s11, 6144 }
  0x47   : > { %p3631_p11 = scmp.ne.s32.totalorder %s4314_s11, %s3630_s27  ;;  %p3637_p0 = scmp.lt.u32.totalorder %s3630_s27, %s4314_s11 }
  0x49   : > { %p3633_p12 = pnand %p3631_p11, %p3933_p7 }
  0x4b   : > { %p3634_p13 = pneg %p3633_p12 }
  0x4d   : > { %p3639_p1 = pnand %p3637_p0, %p3634_p13 }
  0x4f   : > { %3642 = shalt.err (!%p3639_p1)
}
  0x50   : > { %s3643_s0 = scalar_lea.vmem %s3921_s19, 6144  ;;  %p3651_p9 = scmp.lt.s32.totalorder %s3921_s19, %s3921_s19 }
  0x51   : > { %p3644_p4 = scmp.ne.s32.totalorder %s3921_s19, %s3643_s0  ;;  %p3652_p10 = scmp.lt.s32.totalorder %s3643_s0, %s3643_s0 }
  0x53   : > { %p3646_p6 = pnand %p3644_p4, %p3933_p7  ;;  %p3653_p11 = por %p3652_p10, %p3651_p9 }
  0x55   : > { %p3647_p8 = pneg %p3646_p6 }
  0x57   : > { %p3654_p12 = pnand %p3653_p11, %p3647_p8 }
  0x59   : > { %3657 = shalt.err (!%p3654_p12)
}
  0x5a   : > { %3538 = dma.hbm_to_vmem [thread:$0]  (!%p3917_p5), %s4314_s11, 6144, %s3921_s19, [#allocation11], %s3798_s22, %s3798_s22, %s3799_s23  }
  0x5b   : > { %s4337_s17 = sld [smem:[#allocation19_spill]] }
  0x61   : > { %s3658_s27 = scalar_lea.hbm %s4337_s17, 6144 }
  0x62   : > { %p3659_p13 = scmp.ne.s32.totalorder %s4337_s17, %s3658_s27  ;;  %p3665_p4 = scmp.lt.u32.totalorder %s3658_s27, %s4337_s17 }
  0x64   : > { %p3661_p0 = pnand %p3659_p13, %p3933_p7 }
  0x66   : > { %p3662_p1 = pneg %p3661_p0 }
  0x68   : > { %p3667_p6 = pnand %p3665_p4, %p3662_p1 }
  0x6a   : > { %3670 = shalt.err (!%p3667_p6)
}
  0x6b   : > { %s3671_s0 = scalar_lea.vmem %s437_s20, 6144  ;;  %p3679_p11 = scmp.lt.s32.totalorder %s437_s20, %s437_s20 }
  0x6c   : > { %p3672_p8 = scmp.ne.s32.totalorder %s437_s20, %s3671_s0  ;;  %p3680_p12 = scmp.lt.s32.totalorder %s3671_s0, %s3671_s0 }
  0x6e   : > { %p3674_p9 = pnand %p3672_p8, %p3933_p7  ;;  %p3681_p2 = por %p3680_p12, %p3679_p11 }
  0x70   : > { %p3675_p10 = pneg %p3674_p9 }
  0x72   : > { %p3682_p3 = pnand %p3681_p2, %p3675_p10 }
  0x74   : > { %3685 = shalt.err (!%p3682_p3)
}
  0x75   : > { %3523 = dma.hbm_to_vmem [thread:$0]  (!%p3917_p5), %s4337_s17, 6144, %s437_s20, [#allocation3], %s3798_s22, %s3798_s22, %s3799_s23  }
  0x76   : > { %s3800_s12 = smov [#allocation6]   ;;  %s3801_s16 = smov [#allocation9]  }
  0x77   : > { %s468_s14 = sshll.u32 %s3800_s12, 4  ;;  %s500_s27 = sshll.u32 %s3801_s16, 4  ;;  %s469_s14 = int_to_ptr.vmem [resolvable:$true] %s468_s14  ;;  %s501_s27 = int_to_ptr.vmem [resolvable:$true] %s500_s27 }
  0x78   : > { %s3686_s1 = scalar_lea.hbm %s4308_s5, 2048 }
  0x79   : > { %p3687_p2 = scmp.ne.s32.totalorder %s4308_s5, %s3686_s1  ;;  %p3693_p0 = scmp.lt.u32.totalorder %s3686_s1, %s4308_s5 }
  0x7b   : > { %p3689_p3 = pnand %p3687_p2, %p3933_p7 }
  0x7d   : > { %p3690_p13 = pneg %p3689_p3 }
  0x7f   : > { %p3695_p1 = pnand %p3693_p0, %p3690_p13 }
  0x81   : > { %3698 = shalt.err (!%p3695_p1)
}
  0x82   : > { %s3699_s20 = scalar_lea.vmem %s469_s14, 2048  ;;  %p3707_p9 = scmp.lt.s32.totalorder %s469_s14, %s469_s14 }
  0x83   : > { %p3700_p4 = scmp.ne.s32.totalorder %s469_s14, %s3699_s20  ;;  %p3708_p10 = scmp.lt.s32.totalorder %s3699_s20, %s3699_s20 }
  0x85   : > { %p3702_p6 = pnand %p3700_p4, %p3933_p7  ;;  %p3709_p11 = por %p3708_p10, %p3707_p9 }
  0x87   : > { %p3703_p8 = pneg %p3702_p6 }
  0x89   : > { %p3710_p12 = pnand %p3709_p11, %p3703_p8 }
  0x8b   : > { %3713 = shalt.err (!%p3710_p12)
}
  0x8c   : > { %3529 = dma.hbm_to_vmem [thread:$0]  (!%p3917_p5), %s4308_s5, 2048, %s469_s14, [#allocation5], %s3798_s22, %s3798_s22, %s3799_s23  }
  0x8d   : > { %s3714_s29 = scalar_lea.hbm %s4312_s9, 6144 }
  0x8e   : > { %p3715_p2 = scmp.ne.s32.totalorder %s4312_s9, %s3714_s29  ;;  %p3721_p0 = scmp.lt.u32.totalorder %s3714_s29, %s4312_s9 }
  0x90   : > { %p3717_p3 = pnand %p3715_p2, %p3933_p7 }
  0x92   : > { %p3718_p13 = pneg %p3717_p3 }
  0x94   : > { %p3723_p1 = pnand %p3721_p0, %p3718_p13 }
  0x96   : > { %3726 = shalt.err (!%p3723_p1)
}
  0x97   : > { %s3727_s19 = scalar_lea.vmem %s501_s27, 6144  ;;  %p3735_p9 = scmp.lt.s32.totalorder %s501_s27, %s501_s27 }
  0x98   : > { %p3728_p4 = scmp.ne.s32.totalorder %s501_s27, %s3727_s19  ;;  %p3736_p10 = scmp.lt.s32.totalorder %s3727_s19, %s3727_s19 }
  0x9a   : > { %p3730_p6 = pnand %p3728_p4, %p3933_p7  ;;  %p3737_p11 = por %p3736_p10, %p3735_p9 }
  0x9c   : > { %p3731_p8 = pneg %p3730_p6 }
  0x9e   : > { %p3738_p12 = pnand %p3737_p11, %p3731_p8 }
  0xa0   : > { %3741 = shalt.err (!%p3738_p12)
}
  0xa1   : > { %3535 = dma.hbm_to_vmem [thread:$0]  (!%p3917_p5), %s4312_s9, 6144, %s501_s27, [#allocation8], %s3798_s22, %s3798_s22, %s3799_s23  }
  0xa2   : > { %s3802_s3 = smov [#allocation12]   ;;  %s3742_s29 = scalar_lea.hbm %s4316_s13, 6144 }
  0xa3   : > { %s532_s28 = sshll.u32 %s3802_s3, 4  ;;  %p3743_p2 = scmp.ne.s32.totalorder %s4316_s13, %s3742_s29  ;;  %s533_s28 = int_to_ptr.vmem [resolvable:$true] %s532_s28 }
  0xa4   : > { %p3749_p0 = scmp.lt.u32.totalorder %s3742_s29, %s4316_s13 }
  0xa5   : > { %p3745_p3 = pnand %p3743_p2, %p3933_p7 }
  0xa7   : > { %p3746_p13 = pneg %p3745_p3 }
  0xa9   : > { %p3751_p1 = pnand %p3749_p0, %p3746_p13 }
  0xab   : > { %3754 = shalt.err (!%p3751_p1)
}
  0xac   : > { %s3755_s27 = scalar_lea.vmem %s533_s28, 6144  ;;  %p3763_p9 = scmp.lt.s32.totalorder %s533_s28, %s533_s28 }
  0xad   : > { %p3756_p4 = scmp.ne.s32.totalorder %s533_s28, %s3755_s27  ;;  %p3764_p10 = scmp.lt.s32.totalorder %s3755_s27, %s3755_s27 }
  0xaf   : > { %p3758_p6 = pnand %p3756_p4, %p3933_p7  ;;  %p3765_p11 = por %p3764_p10, %p3763_p9 }
  0xb1   : > { %p3759_p8 = pneg %p3758_p6 }
  0xb3   : > { %p3766_p12 = pnand %p3765_p11, %p3759_p8 }
  0xb5   : > { %3769 = shalt.err (!%p3766_p12)
}
  0xb6   : > { %3541 = dma.hbm_to_vmem [thread:$0]  (!%p3917_p5), %s4316_s13, 6144, %s533_s28, [#allocation11], %s3798_s22, %s3798_s22, %s3799_s23  }
  0xb7   : > { %p4338_p2 = scmp.ne.s32.totalorder %s4333_s26, 0 }
  0xb8   : > { %p4339_p7 = scmp.eq.s32.totalorder (!%p4338_p2), %s3900_s25, 0 }
  0xb9   : > { %565 = sbr.rel (%p4338_p2) target bundleno = 1668 (0x684), region = 88 }
  0xc0   : > { %3775 = dma.done.wait (%p4339_p7), [#allocation3], 6144   ;;  %p4340_p3 = pmov %p4339_p7 }
  0xc2   : > { %3777 = vsyncadd (%p4340_p3), [#allocation3], 4294961152  ;;  %p4341_p13 = pmov %p4340_p3 }
  0xc3   : > { %p4342_p0 = pmov %p4340_p3 }
  0xc4   : > { %3779 = dma.done.wait (%p4341_p13), [#allocation5], 8192  }
  0xc5   : > { %3781 = vsyncadd (%p4342_p0), [#allocation5], 4294959104  ;;  %p4343_p1 = pmov %p4342_p0 }
  0xc6   : > { %p4344_p5 = pmov %p4342_p0 }
  0xc7   : > { %3783 = dma.done.wait (%p4343_p1), [#allocation8], 12288  }
  0xc8   : > { %3785 = vsyncadd (%p4344_p5), [#allocation8], 4294955008  ;;  %p4345_p4 = pmov %p4342_p0 }
  0xc9   : > { %p4346_p6 = pmov %p4342_p0 }
  0xca   : > { %3787 = dma.done.wait (%p4345_p4), [#allocation11], 12288  }
  0xcb   : > { %3789 = vsyncadd (%p4346_p6), [#allocation11], 4294955008  ;;  %v695_v0 = vld [vmem:[#allocation2 + $0x80] sm:$0xff]  ;;  %v696_v1 = vld [vmem:[#allocation2 + $0x88] sm:$0xff]  ;;  %p641_p8 = scmp.lt.s32.totalorder %s3900_s25, 1  ;;  %s4347_s22 = sld [smem:[#allocation18_spill]] }
  0xcc   : > { %v679_v2 = vld [vmem:[#allocation2] sm:$0xff]  ;;  %v3044_v3 = vpack.c.bf16 %v696_v1, %v695_v0  ;;  %v680_v4 = vld [vmem:[#allocation2 + $0x8] sm:$0xff]  ;;  %v697_v5 = vld [vmem:[#allocation2 + $0x90] sm:$0xff]  ;;  %vm655_vm0 = vcmask 1041408   ;;  %vm663_vm1 = vcmask 1046528   ;;  %vm671_vm2 = vcmask 1045504  }
  0xcd   : > { %v698_v6 = vld [vmem:[#allocation2 + $0x98] sm:$0xff]  ;;  %v3046_v7 = vpack.c.bf16 %v680_v4, %v679_v2  ;;  %v711_v9 = vld [vmem:[#allocation2 + $0x100] sm:$0xff]  ;;  %v712_v10 = vld [vmem:[#allocation2 + $0x108] sm:$0xff]  ;;  %s4358_s25 = smov (!%p641_p8, %s3900_s25), 1  ;;  %vm1222_vm4 = vcmask 1043456   ;;  %s4353_s26 = sld [smem:[#allocation22_spill]] }
  0xce   : > { %v3048_v8 = vpack.c.bf16 %v698_v6, %v697_v5  ;;  %v681_v11 = vld [vmem:[#allocation2 + $0x10] sm:$0xff]  ;;  %3045 = vmatprep.subr.bf16.mxu0 %v3044_v3  ;;  %v3076_v12 = vpack.c.bf16 %v712_v10, %v711_v9  ;;  %v682_v13 = vld [vmem:[#allocation2 + $0x18] sm:$0xff]  ;;  %v699_v14 = vld [vmem:[#allocation2 + $0xa0] sm:$0xff]  ;;  %s2390_s24 = sshll.u32 %s4358_s25, 4  ;;  %s4355_s28 = sld [smem:[#allocation24_spill]] }
  0xcf   : > { %v700_v15 = vld [vmem:[#allocation2 + $0xa8] sm:$0xff]  ;;  %3047 = vmatpush3.bf16.msra.mxu0 %v3046_v7  ;;  %v3050_v16 = vpack.c.bf16 %v682_v13, %v681_v11  ;;  %v713_v17 = vld [vmem:[#allocation2 + $0x110] sm:$0xff]  ;;  %v714_v18 = vld [vmem:[#allocation2 + $0x118] sm:$0xff] }
  0xd0   : > { %3049 = vmatprep.subr.bf16.mxu0 %v3048_v8  ;;  %3077 = vmatprep.subr.bf16.mxu1 %v3076_v12  ;;  %v3052_v19 = vpack.c.bf16 %v700_v15, %v699_v14  ;;  %v3080_v20 = vpack.c.bf16 %v714_v18, %v713_v17  ;;  %v683_v21 = vld [vmem:[#allocation2 + $0x20] sm:$0xff]  ;;  %v684_v22 = vld [vmem:[#allocation2 + $0x28] sm:$0xff]  ;;  %v701_v23 = vld [vmem:[#allocation2 + $0xb0] sm:$0xff] }
  0xd1   : > { %3079 = vmatpush3.bf16.msra.mxu1 %v3076_v12  ;;  %v702_v24 = vld [vmem:[#allocation2 + $0xb8] sm:$0xff]  ;;  %v715_v25 = vld [vmem:[#allocation2 + $0x120] sm:$0xff]  ;;  %v716_v26 = vld [vmem:[#allocation2 + $0x128] sm:$0xff]  ;;  %v3054_v28 = vpack.c.bf16 %v684_v22, %v683_v21  ;;  %s645_s23 = scalar_lea.vmem %s4347_s22, %s2390_s24 }
  0xd2   : > { %3081 = vmatprep.subr.bf16.mxu1 %v3080_v20  ;;  %v3084_v27 = vpack.c.bf16 %v716_v26, %v715_v25  ;;  %v717_v29 = vld [vmem:[#allocation2 + $0x130] sm:$0xff]  ;;  %v718_v30 = vld [vmem:[#allocation2 + $0x138] sm:$0xff]  ;;  %v3056_v31 = vpack.c.bf16 %v702_v24, %v701_v23  ;;  %v703_v34 = vld [vmem:[#allocation2 + $0xc0] sm:$0xff] }
  0xd3   : > { %3051 = vmatpush3.bf16.msra.mxu0 %v3050_v16  ;;  %v685_v32 = vld [vmem:[#allocation2 + $0x30] sm:$0xff]  ;;  %v686_v33 = vld [vmem:[#allocation2 + $0x38] sm:$0xff]  ;;  %v704_v35 = vld [vmem:[#allocation2 + $0xc8] sm:$0xff]  ;;  %v3088_v36 = vpack.c.bf16 %v718_v30, %v717_v29 }
  0xd4   : > { %3053 = vmatprep.subr.bf16.mxu0 %v3052_v19  ;;  %v3058_v37 = vpack.c.bf16 %v686_v33, %v685_v32  ;;  %v719_v38 = vld [vmem:[#allocation2 + $0x140] sm:$0xff]  ;;  %v720_v39 = vld [vmem:[#allocation2 + $0x148] sm:$0xff]  ;;  %v3060_v40 = vpack.c.bf16 %v704_v35, %v703_v34  ;;  %v705_v43 = vld [vmem:[#allocation2 + $0xd0] sm:$0xff]  ;;  %s650_s12 = scalar_lea.vmem %s4355_s28, %s2390_s24 }
  0xd5   : > { %3083 = vmatpush3.bf16.msra.mxu1 %v3080_v20  ;;  %v687_v41 = vld [vmem:[#allocation2 + $0x40] sm:$0xff]  ;;  %v688_v42 = vld [vmem:[#allocation2 + $0x48] sm:$0xff]  ;;  %v706_v44 = vld [vmem:[#allocation2 + $0xd8] sm:$0xff]  ;;  %v3092_v46 = vpack.c.bf16 %v720_v39, %v719_v38 }
  0xd6   : > { %3085 = vmatprep.subr.bf16.mxu1 %v3084_v27  ;;  %v721_v45 = vld [vmem:[#allocation2 + $0x150] sm:$0xff]  ;;  %v722_v47 = vld [vmem:[#allocation2 + $0x158] sm:$0xff]  ;;  %v4124_v48 = vld [vmem:[%s645_s23] sm:$0xff]  ;;  %v3062_v50 = vpack.c.bf16 %v688_v42, %v687_v41  ;;  %v3064_v53 = vpack.c.bf16 %v706_v44, %v705_v43 }
  0xd7   : > { %3055 = vmatpush3.bf16.msra.mxu0 %v3054_v28  ;;  %v4126_v49 = vld [vmem:[%s645_s23 + $0x8] sm:$0xff]  ;;  %v4129_v51 = vrot.slane %v4124_v48, 6  ;;  %v689_v54 = vld [vmem:[#allocation2 + $0x50] sm:$0xff]  ;;  %v690_v55 = vld [vmem:[#allocation2 + $0x58] sm:$0xff]  ;;  %v3096_v58 = vpack.c.bf16 %v722_v47, %v721_v45  ;;  %s4352_s23 = sld [smem:[#allocation21_spill]] }
  0xd8   : > { %3057 = vmatprep.subr.bf16.mxu0 %v3056_v31  ;;  %v4132_v52 = vrot.slane %v4126_v49, 6  ;;  %v707_v56 = vld [vmem:[#allocation2 + $0xe0] sm:$0xff]  ;;  %v708_v57 = vld [vmem:[#allocation2 + $0xe8] sm:$0xff]  ;;  %v3066_v1 = vpack.c.bf16 %v690_v55, %v689_v54  ;;  %v709_v9 = vld [vmem:[#allocation2 + $0xf0] sm:$0xff] }
  0xd9   : > { %3087 = vmatpush3.bf16.msra.mxu1 %v3084_v27  ;;  %v661_v60 = vsel %vm655_vm0, 0.0, %v4129_v51  ;;  %v723_v2 = vld [vmem:[#allocation2 + $0x160] sm:$0xff]  ;;  %v724_v3 = vld [vmem:[#allocation2 + $0x168] sm:$0xff]  ;;  %v3068_v4 = vpack.c.bf16 %v708_v57, %v707_v56  ;;  %v710_v10 = vld [vmem:[#allocation2 + $0xf8] sm:$0xff] }
  0xda   : > { %3089 = vmatprep.subr.bf16.mxu1 %v3088_v36  ;;  %v4137_v59 = vsel %vm655_vm0, %v4129_v51, %v4132_v52  ;;  %v664_v61 = vrot.slane %v661_v60, 1  ;;  %v672_v63 = vrot.slane %v661_v60, 2  ;;  %v691_v5 = vld [vmem:[#allocation2 + $0x60] sm:$0xff]  ;;  %v692_v6 = vld [vmem:[#allocation2 + $0x68] sm:$0xff]  ;;  %v3100_v11 = vpack.c.bf16 %v724_v3, %v723_v2  ;;  %v725_v13 = vld [vmem:[#allocation2 + $0x170] sm:$0xff] }
  0xdb   : > { %3059 = vmatpush3.bf16.msra.mxu0 %v3058_v37  ;;  %v665_v62 = vrot.slane %v4137_v59, 1  ;;  %v673_v0 = vrot.slane %v4137_v59, 2  ;;  %v3070_v12 = vpack.c.bf16 %v692_v6, %v691_v5  ;;  %v726_v14 = vld [vmem:[#allocation2 + $0x178] sm:$0xff]  ;;  %v3072_v15 = vpack.c.bf16 %v710_v10, %v709_v9  ;;  %v693_v16 = vld [vmem:[#allocation2 + $0x70] sm:$0xff]  ;;  %v927_v18 = vld [vmem:[#allocation4 + $0x80] sm:$0xff] }
  0xdc   : > { %3061 = vmatprep.subr.bf16.mxu0 %v3060_v40  ;;  %v694_v17 = vld [vmem:[#allocation2 + $0x78] sm:$0xff]  ;;  %v928_v19 = vld [vmem:[#allocation4 + $0x88] sm:$0xff]  ;;  %v3104_v20 = vpack.c.bf16 %v726_v14, %v725_v13  ;;  %v943_v22 = vld [vmem:[#allocation4 + $0x100] sm:$0xff]  ;;  %v667_v24 = vrot.slane %v4132_v52, 1  ;;  %v675_v28 = vrot.slane %v4132_v52, 2 }
  0xdd   : > { %3091 = vmatpush3.bf16.msra.mxu1 %v3088_v36  ;;  %v666_v7 = vsel %vm663_vm1, %v664_v61, %v665_v62  ;;  %v674_v8 = vsel %vm671_vm2, %v672_v63, %v673_v0  ;;  %v3074_v21 = vpack.c.bf16 %v694_v17, %v693_v16  ;;  %v944_v23 = vld [vmem:[#allocation4 + $0x108] sm:$0xff]  ;;  %v3108_v25 = vpack.c.bf16 %v928_v19, %v927_v18  ;;  %v911_v26 = vld [vmem:[#allocation4] sm:$0xff]  ;;  %v929_v29 = vld [vmem:[#allocation4 + $0x90] sm:$0xff] }
  0xde   : > { %3093 = vmatprep.subr.bf16.mxu1 %v3092_v46  ;;  %798 = vmatprep.mubr.f32.mxu0 %v666_v7  ;;  %v912_v27 = vld [vmem:[#allocation4 + $0x8] sm:$0xff]  ;;  %v930_v30 = vld [vmem:[#allocation4 + $0x98] sm:$0xff]  ;;  %v3140_v31 = vpack.c.bf16 %v944_v23, %v943_v22  ;;  %vm4148_vm3 = vmneg %vm655_vm0  ;;  %v668_v36 = vsel %vm663_vm1, %v665_v62, %v667_v24  ;;  %v676_v40 = vsel %vm671_vm2, %v673_v0, %v675_v28 }
  0xdf   : > { %3063 = vmatpush3.bf16.msra.mxu0 %v3062_v50  ;;  %2796 = vmatprep.mubr.f32.mxu1 %v674_v8  ;;  %v3110_v33 = vpack.c.bf16 %v912_v27, %v911_v26  ;;  %v945_v34 = vld [vmem:[#allocation4 + $0x110] sm:$0xff]  ;;  %v946_v35 = vld [vmem:[#allocation4 + $0x118] sm:$0xff]  ;;  %v3112_v37 = vpack.c.bf16 %v930_v30, %v929_v29  ;;  %v931_v41 = vld [vmem:[#allocation4 + $0xa0] sm:$0xff] }
  0xe0   : > { %3065 = vmatprep.subr.bf16.mxu0 %v3064_v53  ;;  %v913_v38 = vld [vmem:[#allocation4 + $0x10] sm:$0xff]  ;;  %v914_v39 = vld [vmem:[#allocation4 + $0x18] sm:$0xff]  ;;  %v932_v42 = vld [vmem:[#allocation4 + $0xa8] sm:$0xff]  ;;  %v3144_v43 = vpack.c.bf16 %v946_v35, %v945_v34 }
  0xe1   : > { %3095 = vmatpush3.bf16.msra.mxu1 %v3092_v46  ;;  %v3114_v44 = vpack.c.bf16 %v914_v39, %v913_v38  ;;  %v947_v45 = vld [vmem:[#allocation4 + $0x120] sm:$0xff]  ;;  %v948_v46 = vld [vmem:[#allocation4 + $0x128] sm:$0xff]  ;;  %v3116_v47 = vpack.c.bf16 %v932_v42, %v931_v41  ;;  %v934_v55 = vld [vmem:[#allocation4 + $0xb8] sm:$0xff] }
  0xe2   : > { %3097 = vmatprep.subr.bf16.mxu1 %v3096_v58  ;;  %v915_v50 = vld [vmem:[#allocation4 + $0x20] sm:$0xff]  ;;  %v916_v52 = vld [vmem:[#allocation4 + $0x28] sm:$0xff]  ;;  %v3148_v53 = vpack.c.bf16 %v948_v46, %v947_v45  ;;  %v917_v57 = vld [vmem:[#allocation4 + $0x30] sm:$0xff] }
  0xe3   : > { %3067 = vmatpush3.bf16.msra.mxu0 %v3066_v1  ;;  %v3118_v54 = vpack.c.bf16 %v916_v52, %v915_v50  ;;  %v949_v60 = vld [vmem:[#allocation4 + $0x130] sm:$0xff]  ;;  %v950_v62 = vld [vmem:[#allocation4 + $0x138] sm:$0xff]  ;;  %v936_v0 = vld [vmem:[#allocation4 + $0xc8] sm:$0xff] }
  0xe4   : > { %3069 = vmatprep.subr.bf16.mxu0 %v3068_v4  ;;  %v3152_v63 = vpack.c.bf16 %v950_v62, %v949_v60  ;;  %v919_v2 = vld [vmem:[#allocation4 + $0x40] sm:$0xff]  ;;  %v920_v3 = vld [vmem:[#allocation4 + $0x48] sm:$0xff]  ;;  %v937_v8 = vld [vmem:[#allocation4 + $0xd0] sm:$0xff] }
  0xe5   : > { %3099 = vmatpush3.bf16.msra.mxu1 %v3096_v58  ;;  %v918_v58 = vld [vmem:[#allocation4 + $0x38] sm:$0xff]  ;;  %v951_v4 = vld [vmem:[#allocation4 + $0x140] sm:$0xff]  ;;  %v3126_v5 = vpack.c.bf16 %v920_v3, %v919_v2  ;;  %v952_v6 = vld [vmem:[#allocation4 + $0x148] sm:$0xff] }
  0xe6   : > { %3101 = vmatprep.subr.bf16.mxu1 %v3100_v11  ;;  %v3122_v61 = vpack.c.bf16 %v918_v58, %v917_v57  ;;  %v3156_v7 = vpack.c.bf16 %v952_v6, %v951_v4  ;;  %v938_v9 = vld [vmem:[#allocation4 + $0xd8] sm:$0xff]  ;;  %v953_v13 = vld [vmem:[#allocation4 + $0x150] sm:$0xff]  ;;  %v939_v17 = vld [vmem:[#allocation4 + $0xe0] sm:$0xff] }
  0xe7   : > { %3071 = vmatpush3.bf16.msra.mxu0 %v3070_v12  ;;  %v3128_v10 = vpack.c.bf16 %v938_v9, %v937_v8  ;;  %v922_v12 = vld [vmem:[#allocation4 + $0x58] sm:$0xff]  ;;  %v940_v18 = vld [vmem:[#allocation4 + $0xe8] sm:$0xff]  ;;  %v955_v22 = vld [vmem:[#allocation4 + $0x160] sm:$0xff] }
  0xe8   : > { %3073 = vmatprep.subr.bf16.mxu0 %v3072_v15  ;;  %v954_v15 = vld [vmem:[#allocation4 + $0x158] sm:$0xff]  ;;  %v3132_v19 = vpack.c.bf16 %v940_v18, %v939_v17  ;;  %v956_v24 = vld [vmem:[#allocation4 + $0x168] sm:$0xff]  ;;  %v941_v26 = vld [vmem:[#allocation4 + $0xf0] sm:$0xff] }
  0xe9   : > { %3103 = vmatpush3.bf16.msra.mxu1 %v3100_v11  ;;  %v921_v11 = vld [vmem:[#allocation4 + $0x50] sm:$0xff]  ;;  %v3160_v16 = vpack.c.bf16 %v954_v15, %v953_v13  ;;  %v942_v27 = vld [vmem:[#allocation4 + $0xf8] sm:$0xff]  ;;  %v2372_v41 = vld [vmem:[%s4305_s2] ss:$0 sm:$0xff] }
  0xea   : > { %3105 = vmatprep.subr.bf16.mxu1 %v3104_v20  ;;  %v3130_v14 = vpack.c.bf16 %v922_v12, %v921_v11  ;;  %v3136_v28 = vpack.c.bf16 %v942_v27, %v941_v26  ;;  %v925_v29 = vld [vmem:[#allocation4 + $0x70] sm:$0xff]  ;;  %v926_v30 = vld [vmem:[#allocation4 + $0x78] sm:$0xff]  ;;  %v1124_v11 = vld [vmem:[#allocation6 + $0x20] sm:$0xff] }
  0xeb   : > { %3075 = vmatpush3.bf16.msra.mxu0 %v3074_v21  ;;  %v924_v21 = vld [vmem:[#allocation4 + $0x68] sm:$0xff]  ;;  %v958_v34 = vld [vmem:[#allocation4 + $0x178] sm:$0xff]  ;;  %v1122_v62 = vld [vmem:[#allocation6 + $0x10] sm:$0xff] }
  0xec   : > { %3109 = vmatprep.subr.bf16.mxu0 %v3108_v25  ;;  %v3164_v25 = vpack.c.bf16 %v956_v24, %v955_v22  ;;  %v1125_v12 = vld [vmem:[#allocation6 + $0x28] sm:$0xff]  ;;  %v1127_v15 = vld [vmem:[#allocation6 + $0x38] sm:$0xff]  ;;  %v1128_v17 = vld [vmem:[#allocation6 + $0x40] sm:$0xff] }
  0xed   : > { %3107 = vmatpush3.bf16.msra.mxu1 %v3104_v20  ;;  %v923_v20 = vld [vmem:[#allocation4 + $0x60] sm:$0xff]  ;;  %v3180_v13 = vpack.c.bf16 %v1125_v12, %v1124_v11  ;;  %v1129_v18 = vld [vmem:[#allocation6 + $0x48] sm:$0xff]  ;;  %v1130_v32 = vld [vmem:[#allocation6 + $0x50] sm:$0xff] }
  0xee   : > { %2374 = vmatmul.mubr.msk.f32.vlgmr.msra.gmra.mrb[0].mxu0 %vm4148_vm3, %v4129_v51  ;;  %3141 = vmatprep.subr.bf16.mxu1 %v3140_v31  ;;  %v933_v51 = vld [vmem:[#allocation4 + $0xb0] sm:$0xff]  ;;  %v3134_v23 = vpack.c.bf16 %v924_v21, %v923_v20  ;;  %v1131_v20 = vld [vmem:[#allocation6 + $0x58] sm:$0xff]  ;;  %v1132_v22 = vld [vmem:[#allocation6 + $0x60] sm:$0xff] }
  0xef   : > { %803 = vmatprep.mubr.f32.mxu0 %v668_v36  ;;  %3111 = vmatpush3.bf16.msra.mxu0 %v3110_v33  ;;  %v3120_v56 = vpack.c.bf16 %v934_v55, %v933_v51  ;;  %v3138_v33 = vpack.c.bf16 %v926_v30, %v925_v29  ;;  %v1120_v36 = vld [vmem:[#allocation6] sm:$0xff]  ;;  %v3192_v21 = vpack.c.bf16 %v1131_v20, %v1130_v32  ;;  %v1135_v26 = vld [vmem:[#allocation6 + $0x78] sm:$0xff]  ;;  %v1286_v12 = vld [vmem:[#allocation7 + $0x150] sm:$0xff] }
  0xf0   : > { %2797 = vmatmul.mubr.f32.vlgmr.msra.gmra.mrb[0].mxu1 %v676_v40  ;;  %3113 = vmatprep.subr.bf16.mxu0 %v3112_v37  ;;  %v1121_v37 = vld [vmem:[#allocation6 + $0x8] sm:$0xff]  ;;  %v1260_v27 = vld [vmem:[#allocation7 + $0x80] sm:$0xff]  ;;  %v1271_v11 = vld [vmem:[#allocation7 + $0xd8] sm:$0xff] }
  0xf1   : > { %3143 = vmatpush3.bf16.msra.mxu1 %v3140_v31  ;;  %v957_v31 = vld [vmem:[#allocation4 + $0x170] sm:$0xff]  ;;  %v3172_v38 = vpack.c.bf16 %v1121_v37, %v1120_v36  ;;  %v1276_v29 = vld [vmem:[#allocation7 + $0x100] sm:$0xff]  ;;  %v1273_v32 = vld [vmem:[#allocation7 + $0xe8] sm:$0xff] }
  0xf2   : > { %804 = vmatmul.mubr.f32.gmra.mrb[2].mxu0 %v4137_v59  ;;  %3145 = vmatprep.subr.bf16.mxu1 %v3144_v43  ;;  %v935_v59 = vld [vmem:[#allocation4 + $0xc0] sm:$0xff]  ;;  %v3168_v35 = vpack.c.bf16 %v958_v34, %v957_v31  ;;  %v1277_v31 = vld [vmem:[#allocation7 + $0x108] sm:$0xff]  ;;  %v1262_v37 = vld [vmem:[#allocation7 + $0x90] sm:$0xff] }
  0xf3   : > { %3115 = vmatpush3.bf16.msra.mxu0 %v3114_v44  ;;  %v3124_v1 = vpack.c.bf16 %v936_v0, %v935_v59  ;;  %v1245_v34 = vld [vmem:[#allocation7 + $0x8] sm:$0xff]  ;;  %v1288_v20 = vld [vmem:[#allocation7 + $0x160] sm:$0xff]  ;;  %vm4189_vm5 = vmneg %vm1222_vm4 }
  0xf4   : > { %3117 = vmatprep.subr.bf16.mxu0 %v3116_v47 }
  0xf5   : > { %3147 = vmatpush3.bf16.msra.mxu1 %v3144_v43 }
  0xf6   : > { %3149 = vmatprep.subr.bf16.mxu1 %v3148_v53 }
  0xf7   : > { %3119 = vmatpush3.bf16.msra.mxu0 %v3118_v54 }
  0xf8   : > { %3121 = vmatprep.subr.bf16.mxu0 %v3120_v56 }
  0xf9   : > { %3151 = vmatpush3.bf16.msra.mxu1 %v3148_v53 }
  0xfa   : > { %3153 = vmatprep.subr.bf16.mxu1 %v3152_v63 }
  0xfb   : > { %3123 = vmatpush3.bf16.msra.mxu0 %v3122_v61 }
  0xfc   : > { %3125 = vmatprep.subr.bf16.mxu0 %v3124_v1 }
  0xfd   : > { %3155 = vmatpush3.bf16.msra.mxu1 %v3152_v63  ;;  %v1123_v63 = vld [vmem:[#allocation6 + $0x18] sm:$0xff] }
  0xfe   : > { %3157 = vmatprep.subr.bf16.mxu1 %v3156_v7  ;;  %v3176_v6 = vpack.c.bf16 %v1123_v63, %v1122_v62  ;;  %v1250_v62 = vld [vmem:[#allocation7 + $0x30] sm:$0xff]  ;;  %v1251_v63 = vld [vmem:[#allocation7 + $0x38] sm:$0xff] }
  0xff   : > { %3127 = vmatpush3.bf16.msra.mxu0 %v3126_v5 }
 0x100   : > { %3129 = vmatprep.subr.bf16.mxu0 %v3128_v10 }
 0x101   : > { %3159 = vmatpush3.bf16.msra.mxu1 %v3156_v7 }
 0x102   : > { %3161 = vmatprep.subr.bf16.mxu1 %v3160_v16 }
 0x103   : > { %3131 = vmatpush3.bf16.msra.mxu0 %v3130_v14  ;;  %v1126_v14 = vld [vmem:[#allocation6 + $0x30] sm:$0xff] }
 0x104   : > { %3133 = vmatprep.subr.bf16.mxu0 %v3132_v19  ;;  %v3188_v19 = vpack.c.bf16 %v1129_v18, %v1128_v17 }
 0x105   : > { %3163 = vmatpush3.bf16.msra.mxu1 %v3160_v16  ;;  %v3184_v16 = vpack.c.bf16 %v1127_v15, %v1126_v14  ;;  %v1287_v14 = vld [vmem:[#allocation7 + $0x158] sm:$0xff]  ;;  %v1254_v15 = vld [vmem:[#allocation7 + $0x50] sm:$0xff] }
 0x106   : > { %3165 = vmatprep.subr.bf16.mxu1 %v3164_v25  ;;  %v3256_v17 = vpack.c.bf16 %v1287_v14, %v1286_v12 }
 0x107   : > { %3135 = vmatpush3.bf16.msra.mxu0 %v3134_v23  ;;  %v1133_v23 = vld [vmem:[#allocation6 + $0x68] sm:$0xff] }
 0x108   : > { %3137 = vmatprep.subr.bf16.mxu0 %v3136_v28  ;;  %v3196_v24 = vpack.c.bf16 %v1133_v23, %v1132_v22  ;;  %v1261_v28 = vld [vmem:[#allocation7 + $0x88] sm:$0xff]  ;;  %v1256_v23 = vld [vmem:[#allocation7 + $0x60] sm:$0xff] }
 0x109   : > { %3167 = vmatpush3.bf16.msra.mxu1 %v3164_v25  ;;  %v1134_v25 = vld [vmem:[#allocation6 + $0x70] sm:$0xff]  ;;  %v3204_v30 = vpack.c.bf16 %v1261_v28, %v1260_v27  ;;  %v1289_v22 = vld [vmem:[#allocation7 + $0x168] sm:$0xff]  ;;  %v1275_v27 = vld [vmem:[#allocation7 + $0xf8] sm:$0xff] }
 0x10a   : > { %3169 = vmatprep.subr.bf16.mxu1 %v3168_v35  ;;  %v1290_v28 = vld [vmem:[#allocation7 + $0x170] sm:$0xff] }
 0x10b   : > { %3139 = vmatpush3.bf16.msra.mxu0 %v3138_v33  ;;  %v1244_v33 = vld [vmem:[#allocation7] sm:$0xff] }
 0x10c   : > { %3173 = vmatprep.subr.bf16.mxu0 %v3172_v38  ;;  %v3206_v36 = vpack.c.bf16 %v1245_v34, %v1244_v33  ;;  %v1259_v33 = vld [vmem:[#allocation7 + $0x78] sm:$0xff] }
 0x10d   : > { %3171 = vmatpush3.bf16.msra.mxu1 %v3168_v35  ;;  %v3236_v35 = vpack.c.bf16 %v1277_v31, %v1276_v29  ;;  %v1258_v31 = vld [vmem:[#allocation7 + $0x70] sm:$0xff] }
 0x10e   : > { %3205 = vmatprep.subr.bf16.mxu1 %v3204_v30  ;;  %v1291_v30 = vld [vmem:[#allocation7 + $0x178] sm:$0xff] }
 0x10f   : > { %v3264_v34 = vpack.c.bf16 %v1291_v30, %v1290_v28  ;;  %v1513_v30 = vld [vmem:[#allocation9 + $0x128] sm:$0xff] }
 0x1c1   : > { %v2424_v39 = vpop.f32.mrb[0].mxu0 }
 0x1c2   : > { %v2425_v40 = vpop.f32.mrb[1].mxu0 }
 0x1c3   : > { %v2426_v42 = vadd.f32 %v2425_v40, %v2424_v39  ;;  %v2798_v43 = vpop.f32.mrb[0].mxu1  ;;  %v1278_v39 = vld [vmem:[#allocation7 + $0x110] sm:$0xff] }
 0x1c4   : > { %v875_v44 = vpop.f32.mrb[1].mxu1 }
 0x1c5   : > { %v2427_v45 = vpop.f32.mrb[2].mxu0  ;;  %v801_v46 = vadd.f32 %v2426_v42, %v2372_v41  ;;  %v1246_v42 = vld [vmem:[#allocation7 + $0x10] sm:$0xff] }
 0x1c6   : > { %v2428_v47 = vpop.f32.mrb[3].mxu0 }
 0x1c7   : > { %v2429_v50 = vadd.f32 %v2428_v47, %v2427_v45  ;;  %v876_v52 = vadd.f32 %v875_v44, %v801_v46  ;;  %v1264_v45 = vld [vmem:[#allocation7 + $0xa0] sm:$0xff]  ;;  %v1265_v46 = vld [vmem:[#allocation7 + $0xa8] sm:$0xff] }
 0x1c8   : > { %v1280_v47 = vld [vmem:[#allocation7 + $0x120] sm:$0xff] }
 0x1c9   : > { %v806_v53 = vadd.f32 %v2429_v50, %v2372_v41  ;;  %v884_v54 = vmul.f32 0.01, %v876_v52  ;;  %v1279_v41 = vld [vmem:[#allocation7 + $0x118] sm:$0xff]  ;;  %v3212_v50 = vpack.c.bf16 %v1265_v46, %v1264_v45 }
 0x1cb   : > { %v881_v51 = vadd.f32 %v2798_v43, %v806_v53  ;;  %v886_v55 = vmax.f32 %v876_v52, %v884_v54  ;;  %v1247_v43 = vld [vmem:[#allocation7 + $0x18] sm:$0xff]  ;;  %v1281_v52 = vld [vmem:[#allocation7 + $0x128] sm:$0xff]  ;;  %v1248_v53 = vld [vmem:[#allocation7 + $0x20] sm:$0xff] }
 0x1cc   : > { %v3210_v44 = vpack.c.bf16 %v1247_v43, %v1246_v42  ;;  %v1249_v54 = vld [vmem:[#allocation7 + $0x28] sm:$0xff] }
 0x1cd   : > { %v885_v56 = vmul.f32 0.01, %v881_v51  ;;  %v890_v57 = vrot.slane %v886_v55, 6  ;;  %v1266_v55 = vld [vmem:[#allocation7 + $0xb0] sm:$0xff] }
 0x1cf   : > { %v887_v58 = vmax.f32 %v881_v51, %v885_v56  ;;  %v895_v61 = vsel %vm655_vm0, 0.0, %v890_v57  ;;  %v3244_v51 = vpack.c.bf16 %v1281_v52, %v1280_v47  ;;  %v1267_v56 = vld [vmem:[#allocation7 + $0xb8] sm:$0xff] }
 0x1d0   : > { %v897_v2 = vrot.slane %v895_v61, 1  ;;  %v904_v4 = vrot.slane %v895_v61, 2  ;;  %v3216_v61 = vpack.c.bf16 %v1267_v56, %v1266_v55 }
 0x1d1   : > { %v891_v60 = vrot.slane %v887_v58, 6  ;;  %v1283_v58 = vld [vmem:[#allocation7 + $0x138] sm:$0xff] }
 0x1d3   : > { %v892_v59 = vsel %vm655_vm0, %v890_v57, %v891_v60  ;;  %v907_v0 = vrot.slane %v891_v60, 2  ;;  %v900_v1 = vrot.slane %v891_v60, 1  ;;  %v3214_v60 = vpack.c.bf16 %v1249_v54, %v1248_v53 }
 0x1d4   : > { %v898_v3 = vrot.slane %v892_v59, 1  ;;  %v905_v5 = vrot.slane %v892_v59, 2 }
 0x1d6   : > { %v899_v7 = vsel %vm663_vm1, %v897_v2, %v898_v3  ;;  %v906_v8 = vsel %vm671_vm2, %v904_v4, %v905_v5  ;;  %v908_v9 = vsel %vm671_vm2, %v905_v5, %v907_v0  ;;  %v901_v10 = vsel %vm663_vm1, %v898_v3, %v900_v1  ;;  %v1268_v0 = vld [vmem:[#allocation7 + $0xc0] sm:$0xff]  ;;  %v1269_v1 = vld [vmem:[#allocation7 + $0xc8] sm:$0xff] }
 0x1d7   : > { %1030 = vmatprep.mubr.f32.mxu0 %v899_v7  ;;  %2831 = vmatprep.mubr.f32.mxu1 %v906_v8  ;;  %v1284_v2 = vld [vmem:[#allocation7 + $0x140] sm:$0xff]  ;;  %v1285_v3 = vld [vmem:[#allocation7 + $0x148] sm:$0xff]  ;;  %v3218_v4 = vpack.c.bf16 %v1251_v63, %v1250_v62  ;;  %v3220_v5 = vpack.c.bf16 %v1269_v1, %v1268_v0 }
 0x1d8   : > { %2377 = vmatmul.mubr.msk.f32.vlgmr.msra.gmra.mrb[4].mxu0 %vm4148_vm3, %v890_v57  ;;  %2832 = vmatmul.mubr.f32.vlgmr.msra.gmra.mrb[2].mxu1 %v908_v9  ;;  %v1282_v57 = vld [vmem:[#allocation7 + $0x130] sm:$0xff]  ;;  %v1253_v7 = vld [vmem:[#allocation7 + $0x48] sm:$0xff]  ;;  %v3252_v8 = vpack.c.bf16 %v1285_v3, %v1284_v2 }
 0x1d9   : > { %3175 = vmatpush3.bf16.msra.mxu0 %v3172_v38  ;;  %1035 = vmatprep.mubr.f32.mxu0 %v901_v10  ;;  %v1263_v38 = vld [vmem:[#allocation7 + $0x98] sm:$0xff]  ;;  %v1270_v10 = vld [vmem:[#allocation7 + $0xd0] sm:$0xff] }
 0x1da   : > { %3177 = vmatprep.subr.bf16.mxu0 %v3176_v6  ;;  %v3208_v40 = vpack.c.bf16 %v1263_v38, %v1262_v37  ;;  %3207 = vmatpush3.bf16.msra.mxu1 %v3206_v36  ;;  %v1492_v36 = vld [vmem:[#allocation9 + $0x80] sm:$0xff]  ;;  %v1493_v37 = vld [vmem:[#allocation9 + $0x88] sm:$0xff] }
 0x1db   : > { %v1508_v38 = vld [vmem:[#allocation9 + $0x100] sm:$0xff] }
 0x1dc   : > { %1036 = vmatmul.mubr.f32.gmra.mrb[6].mxu0 %v892_v59  ;;  %3209 = vmatprep.subr.bf16.mxu1 %v3208_v40  ;;  %v3248_v59 = vpack.c.bf16 %v1283_v58, %v1282_v57  ;;  %v1509_v40 = vld [vmem:[#allocation9 + $0x108] sm:$0xff]  ;;  %v2378_v58 = vld [vmem:[%s4309_s6] ss:$0 sm:$0xff] }
 0x1dd   : > { %3179 = vmatpush3.bf16.msra.mxu0 %v3176_v6  ;;  %2866 = vmatprep.mubr.f32.mxu0 %v4124_v48  ;;  %v3200_v48 = vpack.c.bf16 %v1135_v26, %v1134_v25  ;;  %v1252_v6 = vld [vmem:[#allocation7 + $0x40] sm:$0xff]  ;;  %v3260_v25 = vpack.c.bf16 %v1289_v22, %v1288_v20 }
 0x1de   : > { %3181 = vmatprep.subr.bf16.mxu0 %v3180_v13  ;;  %3211 = vmatpush3.bf16.msra.mxu1 %v3210_v44  ;;  %v3222_v9 = vpack.c.bf16 %v1253_v7, %v1252_v6  ;;  %v2375_v44 = vld [vmem:[%s4307_s4] ss:$0 sm:$0xff]  ;;  %v1477_v6 = vld [vmem:[#allocation9 + $0x8] sm:$0xff]  ;;  %v1494_v7 = vld [vmem:[#allocation9 + $0x90] sm:$0xff] }
 0x1df   : > { %3213 = vmatprep.subr.bf16.mxu1 %v3212_v50 }
 0x1e1   : > { %3183 = vmatpush3.bf16.msra.mxu0 %v3180_v13  ;;  %v3224_v13 = vpack.c.bf16 %v1271_v11, %v1270_v10 }
 0x1e2   : > { %3185 = vmatprep.subr.bf16.mxu0 %v3184_v16  ;;  %3215 = vmatpush3.bf16.msra.mxu1 %v3214_v60 }
 0x1e3   : > { %3217 = vmatprep.subr.bf16.mxu1 %v3216_v61 }
 0x1e5   : > { %3187 = vmatpush3.bf16.msra.mxu0 %v3184_v16  ;;  %v1255_v16 = vld [vmem:[#allocation7 + $0x58] sm:$0xff] }
 0x1e6   : > { %3189 = vmatprep.subr.bf16.mxu0 %v3188_v19  ;;  %3219 = vmatpush3.bf16.msra.mxu1 %v3218_v4  ;;  %v3226_v18 = vpack.c.bf16 %v1255_v16, %v1254_v15  ;;  %v1510_v16 = vld [vmem:[#allocation9 + $0x110] sm:$0xff] }
 0x1e7   : > { %3221 = vmatprep.subr.bf16.mxu1 %v3220_v5  ;;  %v1476_v5 = vld [vmem:[#allocation9] sm:$0xff] }
 0x1e9   : > { %3191 = vmatpush3.bf16.msra.mxu0 %v3188_v19  ;;  %v1272_v19 = vld [vmem:[#allocation7 + $0xe0] sm:$0xff] }
 0x1ea   : > { %3193 = vmatprep.subr.bf16.mxu0 %v3192_v21  ;;  %3223 = vmatpush3.bf16.msra.mxu1 %v3222_v9 }
 0x1eb   : > { %3225 = vmatprep.subr.bf16.mxu1 %v3224_v13 }
 0x1ed   : > { %3195 = vmatpush3.bf16.msra.mxu0 %v3192_v21  ;;  %v3228_v21 = vpack.c.bf16 %v1273_v32, %v1272_v19  ;;  %v3270_v19 = vpack.c.bf16 %v1477_v6, %v1476_v5  ;;  %v1505_v5 = vld [vmem:[#allocation9 + $0xe8] sm:$0xff]  ;;  %v1520_v6 = vld [vmem:[#allocation9 + $0x160] sm:$0xff] }
 0x1ee   : > { %3197 = vmatprep.subr.bf16.mxu0 %v3196_v24  ;;  %3227 = vmatpush3.bf16.msra.mxu1 %v3226_v18 }
 0x1ef   : > { %3229 = vmatprep.subr.bf16.mxu1 %v3228_v21 }
 0x1f1   : > { %3199 = vmatpush3.bf16.msra.mxu0 %v3196_v24  ;;  %v1257_v24 = vld [vmem:[#allocation7 + $0x68] sm:$0xff] }
 0x1f2   : > { %3201 = vmatprep.subr.bf16.mxu0 %v3200_v48  ;;  %v3230_v26 = vpack.c.bf16 %v1257_v24, %v1256_v23  ;;  %v1478_v24 = vld [vmem:[#allocation9 + $0x10] sm:$0xff] }
 0x1f4   : > { %3231 = vmatpush3.bf16.msra.mxu1 %v3230_v26 }
 0x1f5   : > { %3203 = vmatpush3.bf16.msra.mxu0 %v3200_v48  ;;  %v1274_v48 = vld [vmem:[#allocation7 + $0xf0] sm:$0xff] }
 0x1f6   : > { %3237 = vmatprep.subr.bf16.mxu0 %v3236_v35  ;;  %v3232_v29 = vpack.c.bf16 %v1275_v27, %v1274_v48  ;;  %v1496_v48 = vld [vmem:[#allocation9 + $0xa0] sm:$0xff]  ;;  %v1497_v27 = vld [vmem:[#allocation9 + $0xa8] sm:$0xff] }
 0x1f8   : > { %2867 = vmatmul.mubr.f32.vlgmr.msra.gmra.mrb[8].mxu0 %v4126_v49  ;;  %v3240_v49 = vpack.c.bf16 %v1279_v41, %v1278_v39  ;;  %3233 = vmatprep.subr.bf16.mxu1 %v3232_v29  ;;  %v3268_v39 = vpack.c.bf16 %v1493_v37, %v1492_v36  ;;  %v4171_v41 = vpack.c.bf16 %v1509_v40, %v1508_v38  ;;  %v1512_v29 = vld [vmem:[#allocation9 + $0x120] sm:$0xff]  ;;  %v1481_v36 = vld [vmem:[#allocation9 + $0x28] sm:$0xff]  ;;  %v1498_v38 = vld [vmem:[#allocation9 + $0xb0] sm:$0xff] }
 0x1f9   : > { %3239 = vmatpush3.bf16.msra.mxu0 %v3236_v35  ;;  %v3234_v35 = vpack.c.bf16 %v1259_v33, %v1258_v31  ;;  %v3276_v33 = vpack.c.bf16 %v1497_v27, %v1496_v48  ;;  %v1514_v40 = vld [vmem:[#allocation9 + $0x130] sm:$0xff] }
 0x1fa   : > { %3241 = vmatprep.subr.bf16.mxu0 %v3240_v49 }
 0x1fb   : > { %3235 = vmatpush3.bf16.msra.mxu1 %v3234_v35  ;;  %v1480_v35 = vld [vmem:[#allocation9 + $0x20] sm:$0xff] }
 0x1fc   : > { %3269 = vmatprep.subr.bf16.mxu1 %v3268_v39  ;;  %v3278_v37 = vpack.c.bf16 %v1481_v36, %v1480_v35  ;;  %v1499_v39 = vld [vmem:[#allocation9 + $0xb8] sm:$0xff] }
 0x1fd   : > { %3243 = vmatpush3.bf16.msra.mxu0 %v3240_v49 }
 0x1fe   : > { %3245 = vmatprep.subr.bf16.mxu0 %v3244_v51 }
 0x201   : > { %3247 = vmatpush3.bf16.msra.mxu0 %v3244_v51 }
 0x202   : > { %3249 = vmatprep.subr.bf16.mxu0 %v3248_v59 }
 0x205   : > { %3251 = vmatpush3.bf16.msra.mxu0 %v3248_v59 }
 0x206   : > { %3253 = vmatprep.subr.bf16.mxu0 %v3252_v8 }
 0x209   : > { %3255 = vmatpush3.bf16.msra.mxu0 %v3252_v8  ;;  %v1495_v8 = vld [vmem:[#allocation9 + $0x98] sm:$0xff] }
 0x20a   : > { %3257 = vmatprep.subr.bf16.mxu0 %v3256_v17  ;;  %v3272_v32 = vpack.c.bf16 %v1495_v8, %v1494_v7  ;;  %v1521_v8 = vld [vmem:[#allocation9 + $0x168] sm:$0xff] }
 0x20d   : > { %3259 = vmatpush3.bf16.msra.mxu0 %v3256_v17  ;;  %v1511_v17 = vld [vmem:[#allocation9 + $0x118] sm:$0xff] }
 0x20e   : > { %3261 = vmatprep.subr.bf16.mxu0 %v3260_v25  ;;  %v3304_v26 = vpack.c.bf16 %v1511_v17, %v1510_v16  ;;  %v1523_v17 = vld [vmem:[#allocation9 + $0x178] sm:$0xff] }
 0x211   : > { %3263 = vmatpush3.bf16.msra.mxu0 %v3260_v25  ;;  %v1479_v25 = vld [vmem:[#allocation9 + $0x18] sm:$0xff] }
 0x212   : > { %3265 = vmatprep.subr.bf16.mxu0 %v3264_v34  ;;  %v3274_v31 = vpack.c.bf16 %v1479_v25, %v1478_v24  ;;  %v1729_v24 = vld [vmem:[#allocation10 + $0x100] sm:$0xff] }
 0x215   : > { %3267 = vmatpush3.bf16.msra.mxu0 %v3264_v34  ;;  %v3308_v34 = vpack.c.bf16 %v1513_v30, %v1512_v29  ;;  %v2379_v30 = vld [vmem:[%s4311_s8] ss:$0 sm:$0xff] }
 0x216   : > { %3301 = vmatprep.subr.bf16.mxu0 %v4171_v41 }
 0x2ab   : > { %v2480_v42 = vpop.f32.mrb[4].mxu0  ;;  %v2833_v43 = vpop.f32.mrb[2].mxu1 }
 0x2ac   : > { %v2481_v49 = vpop.f32.mrb[5].mxu0  ;;  %v1107_v45 = vpop.f32.mrb[3].mxu1 }
 0x2ad   : > { %v2482_v46 = vadd.f32 %v2481_v49, %v2480_v42  ;;  %v3280_v42 = vpack.c.bf16 %v1499_v39, %v1498_v38  ;;  %v1483_v49 = vld [vmem:[#allocation9 + $0x38] sm:$0xff] }
 0x2af   : > { %v1033_v47 = vadd.f32 %v2482_v46, %v2375_v44  ;;  %v2483_v50 = vpop.f32.mrb[6].mxu0  ;;  %v1500_v46 = vld [vmem:[#allocation9 + $0xc0] sm:$0xff] }
 0x2b0   : > { %v2484_v52 = vpop.f32.mrb[7].mxu0 }
 0x2b1   : > { %v1108_v53 = vadd.f32 %v1107_v45, %v1033_v47  ;;  %v2485_v54 = vadd.f32 %v2484_v52, %v2483_v50  ;;  %v1501_v47 = vld [vmem:[#allocation9 + $0xc8] sm:$0xff]  ;;  %v1516_v50 = vld [vmem:[#allocation9 + $0x140] sm:$0xff] }
 0x2b2   : > { %v3284_v52 = vpack.c.bf16 %v1501_v47, %v1500_v46  ;;  %v1697_v47 = vld [vmem:[#allocation10] sm:$0xff] }
 0x2b3   : > { %v1038_v51 = vadd.f32 %v2485_v54, %v2375_v44  ;;  %v1116_v57 = vmul.f32 0.01, %v1108_v53  ;;  %v1484_v54 = vld [vmem:[#allocation9 + $0x40] sm:$0xff] }
 0x2b5   : > { %v1113_v55 = vadd.f32 %v2833_v43, %v1038_v51  ;;  %v1118_v59 = vmax.f32 %v1108_v53, %v1116_v57  ;;  %v1515_v43 = vld [vmem:[#allocation9 + $0x138] sm:$0xff]  ;;  %v1517_v53 = vld [vmem:[#allocation9 + $0x148] sm:$0xff]  ;;  %v1502_v57 = vld [vmem:[#allocation9 + $0xd0] sm:$0xff] }
 0x2b6   : > { %v3312_v44 = vpack.c.bf16 %v1515_v43, %v1514_v40  ;;  %v1485_v51 = vld [vmem:[#allocation9 + $0x48] sm:$0xff] }
 0x2b7   : > { %v1117_v56 = vmul.f32 0.01, %v1113_v55 }
 0x2b9   : > { %v1119_v61 = vmax.f32 %v1113_v55, %v1117_v56  ;;  %v3316_v55 = vpack.c.bf16 %v1517_v53, %v1516_v50  ;;  %v3286_v56 = vpack.c.bf16 %v1485_v51, %v1484_v54  ;;  %v1698_v50 = vld [vmem:[#allocation10 + $0x8] sm:$0xff]  ;;  %v1716_v53 = vld [vmem:[#allocation10 + $0x98] sm:$0xff] }
 0x2cb   : > { %v2868_v60 = vpop.f32.mrb[8].mxu0 }
 0x2cc   : > { %v1215_v62 = vadd.f32 %v2868_v60, %v2378_v58  ;;  %v1209_v63 = vpop.f32.mrb[9].mxu0  ;;  %v1518_v60 = vld [vmem:[#allocation9 + $0x150] sm:$0xff] }
 0x2cd   : > { %v1210_v0 = vadd.f32 %v2378_v58, %v1209_v63  ;;  %v1503_v58 = vld [vmem:[#allocation9 + $0xd8] sm:$0xff]  ;;  %v1486_v63 = vld [vmem:[#allocation9 + $0x50] sm:$0xff] }
 0x2ce   : > { %v4180_v1 = vadd.f32 %v1215_v62, %v1119_v61  ;;  %v3288_v61 = vpack.c.bf16 %v1503_v58, %v1502_v57  ;;  %v1519_v62 = vld [vmem:[#allocation9 + $0x158] sm:$0xff] }
 0x2cf   : > { %v4182_v2 = vadd.f32 %v1210_v0, %v1118_v59  ;;  %v1487_v59 = vld [vmem:[#allocation9 + $0x58] sm:$0xff]  ;;  %v3320_v0 = vpack.c.bf16 %v1519_v62, %v1518_v60 }
 0x2d0   : > { %v1224_v3 = vrot.slane %v4180_v1, 4  ;;  %v1732_v62 = vld [vmem:[#allocation10 + $0x118] sm:$0xff] }
 0x2d1   : > { %v1223_v4 = vrot.slane %v4182_v2, 4 }
 0x2d2   : > { %v1240_v11 = vrot.slane %v1224_v3, 4  ;;  %v1233_v23 = vrot.slane %v1224_v3, 2 }
 0x2d3   : > { %v1225_v9 = vsel %vm1222_vm4, %v1223_v4, %v1224_v3  ;;  %v1228_v10 = vsel %vm1222_vm4, 0.0, %v1223_v4  ;;  %v3290_v3 = vpack.c.bf16 %v1487_v59, %v1486_v63  ;;  %v3334_v63 = vpack.c.bf16 %v1698_v50, %v1697_v47  ;;  %v1742_v50 = vld [vmem:[#allocation10 + $0x168] sm:$0xff] }
 0x2d4   : > { %v1230_v12 = vrot.slane %v1228_v10, 2  ;;  %v1231_v13 = vrot.slane %v1225_v9, 2  ;;  %v1237_v14 = vrot.slane %v1228_v10, 4  ;;  %v1238_v15 = vrot.slane %v1225_v9, 4  ;;  %v1489_v10 = vld [vmem:[#allocation9 + $0x68] sm:$0xff] }
 0x2d6   : > { %v1232_v20 = vsel %vm671_vm2, %v1230_v12, %v1231_v13  ;;  %v1239_v21 = vsel %vm1222_vm4, %v1237_v14, %v1238_v15  ;;  %v1241_v22 = vsel %vm1222_vm4, %v1238_v15, %v1240_v11  ;;  %v1234_v28 = vsel %vm671_vm2, %v1231_v13, %v1233_v23  ;;  %v1506_v13 = vld [vmem:[#allocation9 + $0xf0] sm:$0xff]  ;;  %v1507_v14 = vld [vmem:[#allocation9 + $0xf8] sm:$0xff]  ;;  %v1714_v23 = vld [vmem:[#allocation10 + $0x88] sm:$0xff] }
 0x2d7   : > { %1363 = vmatprep.mubr.f32.mxu1 %v1232_v20  ;;  %2901 = vmatprep.mubr.f32.mxu0 %v1239_v21  ;;  %v3324_v11 = vpack.c.bf16 %v1521_v8, %v1520_v6  ;;  %v1522_v15 = vld [vmem:[#allocation9 + $0x170] sm:$0xff]  ;;  %v3296_v16 = vpack.c.bf16 %v1507_v14, %v1506_v13 }
 0x2d8   : > { %2381 = vmatmul.mubr.msk.f32.vlgmr.msra.gmra.mrb[4].mxu1 %vm4189_vm5, %v1223_v4  ;;  %2902 = vmatmul.mubr.f32.vlgmr.msra.gmra.mrb[10].mxu0 %v1241_v22  ;;  %v1504_v4 = vld [vmem:[#allocation9 + $0xe0] sm:$0xff]  ;;  %v3328_v20 = vpack.c.bf16 %v1523_v17, %v1522_v15  ;;  %v1699_v6 = vld [vmem:[#allocation10 + $0x10] sm:$0xff] }
 0x2d9   : > { %1368 = vmatprep.mubr.f32.mxu1 %v1234_v28  ;;  %3271 = vmatpush3.bf16.msra.mxu1 %v3270_v19  ;;  %v3292_v7 = vpack.c.bf16 %v1505_v5, %v1504_v4  ;;  %v1490_v19 = vld [vmem:[#allocation9 + $0x70] sm:$0xff]  ;;  %v1713_v22 = vld [vmem:[#allocation10 + $0x80] sm:$0xff] }
 0x2da   : > { %3303 = vmatpush3.bf16.msra.mxu0 %v4171_v41  ;;  %3273 = vmatprep.subr.bf16.mxu1 %v3272_v32  ;;  %v1482_v41 = vld [vmem:[#allocation9 + $0x30] sm:$0xff]  ;;  %v1491_v32 = vld [vmem:[#allocation9 + $0x78] sm:$0xff]  ;;  %v3332_v25 = vpack.c.bf16 %v1714_v23, %v1713_v22  ;;  %v1701_v15 = vld [vmem:[#allocation10 + $0x20] sm:$0xff] }
 0x2db   : > { %3305 = vmatprep.subr.bf16.mxu0 %v3304_v26  ;;  %v3282_v45 = vpack.c.bf16 %v1483_v49, %v1482_v41  ;;  %v3298_v21 = vpack.c.bf16 %v1491_v32, %v1490_v19  ;;  %v1719_v19 = vld [vmem:[#allocation10 + $0xb0] sm:$0xff]  ;;  %v1720_v32 = vld [vmem:[#allocation10 + $0xb8] sm:$0xff] }
 0x2dc   : > { %1369 = vmatmul.mubr.f32.gmra.mrb[6].mxu1 %v1225_v9  ;;  %v1488_v9 = vld [vmem:[#allocation9 + $0x60] sm:$0xff]  ;;  %v3344_v22 = vpack.c.bf16 %v1720_v32, %v1719_v19  ;;  %v1703_v23 = vld [vmem:[#allocation10 + $0x30] sm:$0xff] }
 0x2dd   : > { %3275 = vmatpush3.bf16.msra.mxu1 %v3274_v31  ;;  %v3294_v12 = vpack.c.bf16 %v1489_v10, %v1488_v9  ;;  %v1717_v9 = vld [vmem:[#allocation10 + $0xa0] sm:$0xff]  ;;  %v1718_v10 = vld [vmem:[#allocation10 + $0xa8] sm:$0xff] }
 0x2de   : > { %3307 = vmatpush3.bf16.msra.mxu0 %v3304_v26  ;;  %3277 = vmatprep.subr.bf16.mxu1 %v3276_v33  ;;  %v1730_v26 = vld [vmem:[#allocation10 + $0x108] sm:$0xff]  ;;  %v3340_v14 = vpack.c.bf16 %v1718_v10, %v1717_v9 }
 0x2df   : > { %3309 = vmatprep.subr.bf16.mxu0 %v3308_v34  ;;  %v3364_v48 = vpack.c.bf16 %v1730_v26, %v1729_v24  ;;  %v1704_v24 = vld [vmem:[#allocation10 + $0x38] sm:$0xff] }
 0x2e0   : > { %v3346_v26 = vpack.c.bf16 %v1704_v24, %v1703_v23  ;;  %v3803_v24 = vmov 0.0  }
 0x2e1   : > { %3279 = vmatpush3.bf16.msra.mxu1 %v3278_v37 }
 0x2e2   : > { %3311 = vmatpush3.bf16.msra.mxu0 %v3308_v34  ;;  %3281 = vmatprep.subr.bf16.mxu1 %v3280_v42 }
 0x2e3   : > { %3313 = vmatprep.subr.bf16.mxu0 %v3312_v44 }
 0x2e5   : > { %3283 = vmatpush3.bf16.msra.mxu1 %v3282_v45 }
 0x2e6   : > { %3315 = vmatpush3.bf16.msra.mxu0 %v3312_v44  ;;  %3285 = vmatprep.subr.bf16.mxu1 %v3284_v52  ;;  %v1715_v52 = vld [vmem:[#allocation10 + $0x90] sm:$0xff] }
 0x2e7   : > { %3317 = vmatprep.subr.bf16.mxu0 %v3316_v55  ;;  %v3336_v59 = vpack.c.bf16 %v1716_v53, %v1715_v52  ;;  %v1709_v52 = vld [vmem:[#allocation10 + $0x60] sm:$0xff]  ;;  %v1710_v53 = vld [vmem:[#allocation10 + $0x68] sm:$0xff] }
 0x2e9   : > { %3287 = vmatpush3.bf16.msra.mxu1 %v3286_v56 }
 0x2ea   : > { %3319 = vmatpush3.bf16.msra.mxu0 %v3316_v55  ;;  %3289 = vmatprep.subr.bf16.mxu1 %v3288_v61  ;;  %v1731_v61 = vld [vmem:[#allocation10 + $0x110] sm:$0xff] }
 0x2eb   : > { %3321 = vmatprep.subr.bf16.mxu0 %v3320_v0  ;;  %v3368_v8 = vpack.c.bf16 %v1732_v62, %v1731_v61  ;;  %v1711_v61 = vld [vmem:[#allocation10 + $0x70] sm:$0xff]  ;;  %v1712_v62 = vld [vmem:[#allocation10 + $0x78] sm:$0xff] }
 0x2ed   : > { %3291 = vmatpush3.bf16.msra.mxu1 %v3290_v3 }
 0x2ee   : > { %3323 = vmatpush3.bf16.msra.mxu0 %v3320_v0  ;;  %3293 = vmatprep.subr.bf16.mxu1 %v3292_v7  ;;  %v1700_v7 = vld [vmem:[#allocation10 + $0x18] sm:$0xff] }
 0x2ef   : > { %3325 = vmatprep.subr.bf16.mxu0 %v3324_v11  ;;  %v3338_v13 = vpack.c.bf16 %v1700_v7, %v1699_v6  ;;  %v1947_v6 = vld [vmem:[#allocation12 + $0x108] sm:$0xff] }
 0x2f1   : > { %3295 = vmatpush3.bf16.msra.mxu1 %v3294_v12  ;;  %v1734_v12 = vld [vmem:[#allocation10 + $0x128] sm:$0xff] }
 0x2f2   : > { %3327 = vmatpush3.bf16.msra.mxu0 %v3324_v11  ;;  %3297 = vmatprep.subr.bf16.mxu1 %v3296_v16  ;;  %v1733_v11 = vld [vmem:[#allocation10 + $0x120] sm:$0xff]  ;;  %v1702_v16 = vld [vmem:[#allocation10 + $0x28] sm:$0xff] }
 0x2f3   : > { %3329 = vmatprep.subr.bf16.mxu0 %v3328_v20  ;;  %v3372_v17 = vpack.c.bf16 %v1734_v12, %v1733_v11  ;;  %v3342_v18 = vpack.c.bf16 %v1702_v16, %v1701_v15  ;;  %v2382_v11 = vld [vmem:[%s4313_s10] ss:$0 sm:$0xff] }
 0x2f5   : > { %3299 = vmatpush3.bf16.msra.mxu1 %v3298_v21  ;;  %v1736_v21 = vld [vmem:[#allocation10 + $0x138] sm:$0xff] }
 0x2f6   : > { %3331 = vmatpush3.bf16.msra.mxu0 %v3328_v20  ;;  %3333 = vmatprep.subr.bf16.mxu1 %v3332_v25  ;;  %v1735_v20 = vld [vmem:[#allocation10 + $0x130] sm:$0xff] }
 0x2f7   : > { %3365 = vmatprep.subr.bf16.mxu0 %v3364_v48  ;;  %v3376_v25 = vpack.c.bf16 %v1736_v21, %v1735_v20 }
 0x3ab   : > { %v2554_v27 = vpop.f32.mrb[4].mxu1  ;;  %v2903_v28 = vpop.f32.mrb[10].mxu0 }
 0x3ac   : > { %v2555_v29 = vpop.f32.mrb[5].mxu1  ;;  %v1440_v31 = vpop.f32.mrb[11].mxu0 }
 0x3ad   : > { %v2556_v33 = vadd.f32 %v2555_v29, %v2554_v27  ;;  %v1722_v27 = vld [vmem:[#allocation10 + $0xc8] sm:$0xff] }
 0x3af   : > { %v1366_v34 = vadd.f32 %v2556_v33, %v2379_v30  ;;  %v2557_v35 = vpop.f32.mrb[6].mxu1  ;;  %v1706_v33 = vld [vmem:[#allocation10 + $0x48] sm:$0xff] }
 0x3b0   : > { %v2558_v36 = vpop.f32.mrb[7].mxu1 }
 0x3b1   : > { %v1441_v37 = vadd.f32 %v1440_v31, %v1366_v34  ;;  %v2559_v38 = vadd.f32 %v2558_v36, %v2557_v35  ;;  %v1705_v31 = vld [vmem:[#allocation10 + $0x40] sm:$0xff]  ;;  %v1723_v36 = vld [vmem:[#allocation10 + $0xd0] sm:$0xff] }
 0x3b2   : > { %v3350_v35 = vpack.c.bf16 %v1706_v33, %v1705_v31 }
 0x3b3   : > { %v1449_v39 = vmul.f32 0.01, %v1441_v37  ;;  %v1371_v40 = vadd.f32 %v2559_v38, %v2379_v30  ;;  %v1738_v30 = vld [vmem:[#allocation10 + $0x148] sm:$0xff]  ;;  %v1739_v38 = vld [vmem:[#allocation10 + $0x150] sm:$0xff] }
 0x3b5   : > { %v1451_v42 = vmax.f32 %v1441_v37, %v1449_v39  ;;  %v1446_v43 = vadd.f32 %v2903_v28, %v1371_v40  ;;  %v1737_v28 = vld [vmem:[#allocation10 + $0x140] sm:$0xff]  ;;  %v1724_v37 = vld [vmem:[#allocation10 + $0xd8] sm:$0xff] }
 0x3b6   : > { %v3380_v34 = vpack.c.bf16 %v1738_v30, %v1737_v28  ;;  %v3352_v39 = vpack.c.bf16 %v1724_v37, %v1723_v36  ;;  %v1740_v40 = vld [vmem:[#allocation10 + $0x158] sm:$0xff]  ;;  %v1916_v37 = vld [vmem:[#allocation12 + $0x10] sm:$0xff] }
 0x3b7   : > { %v1455_v41 = vrot.slane %v1451_v42, 4  ;;  %v1450_v49 = vmul.f32 0.01, %v1446_v43  ;;  %v1707_v42 = vld [vmem:[#allocation10 + $0x50] sm:$0xff]  ;;  %v1933_v28 = vld [vmem:[#allocation12 + $0x98] sm:$0xff] }
 0x3b8   : > { %v1949_v30 = vld [vmem:[#allocation12 + $0x118] sm:$0xff] }
 0x3b9   : > { %v1452_v44 = vmax.f32 %v1446_v43, %v1450_v49  ;;  %v1460_v46 = vsel %vm1222_vm4, 0.0, %v1455_v41  ;;  %v1708_v43 = vld [vmem:[#allocation10 + $0x58] sm:$0xff] }
 0x3ba   : > { %v1462_v56 = vrot.slane %v1460_v46, 2  ;;  %v1469_v58 = vrot.slane %v1460_v46, 4  ;;  %v3354_v49 = vpack.c.bf16 %v1708_v43, %v1707_v42  ;;  %v1741_v46 = vld [vmem:[#allocation10 + $0x160] sm:$0xff]  ;;  %v1935_v42 = vld [vmem:[#allocation12 + $0xa8] sm:$0xff] }
 0x3bb   : > { %v1456_v45 = vrot.slane %v1452_v44, 4  ;;  %v1725_v44 = vld [vmem:[#allocation10 + $0xe0] sm:$0xff] }
 0x3bc   : > { %v1950_v43 = vld [vmem:[#allocation12 + $0x120] sm:$0xff] }
 0x3bd   : > { %v1457_v54 = vsel %vm1222_vm4, %v1455_v41, %v1456_v45  ;;  %v1472_v51 = vrot.slane %v1456_v45, 4  ;;  %v1465_v55 = vrot.slane %v1456_v45, 2  ;;  %v1726_v45 = vld [vmem:[#allocation10 + $0xe8] sm:$0xff] }
 0x3be   : > { %v1463_v57 = vrot.slane %v1457_v54, 2  ;;  %v1470_v60 = vrot.slane %v1457_v54, 4  ;;  %v3356_v47 = vpack.c.bf16 %v1726_v45, %v1725_v44 }
 0x3c0   : > { %v1464_v0 = vsel %vm671_vm2, %v1462_v56, %v1463_v57  ;;  %v1471_v3 = vsel %vm1222_vm4, %v1469_v58, %v1470_v60  ;;  %v1473_v4 = vsel %vm1222_vm4, %v1470_v60, %v1472_v51  ;;  %v1466_v5 = vsel %vm671_vm2, %v1463_v57, %v1465_v55  ;;  %v1727_v55 = vld [vmem:[#allocation10 + $0xf0] sm:$0xff]  ;;  %v1728_v56 = vld [vmem:[#allocation10 + $0xf8] sm:$0xff] }
 0x3c1   : > { %1595 = vmatprep.mubr.f32.mxu1 %v1464_v0  ;;  %2936 = vmatprep.mubr.f32.mxu0 %v1471_v3  ;;  %v3358_v51 = vpack.c.bf16 %v1710_v53, %v1709_v52  ;;  %v1743_v57 = vld [vmem:[#allocation10 + $0x170] sm:$0xff]  ;;  %v3360_v58 = vpack.c.bf16 %v1728_v56, %v1727_v55  ;;  %v1744_v60 = vld [vmem:[#allocation10 + $0x178] sm:$0xff]  ;;  %v1930_v0 = vld [vmem:[#allocation12 + $0x80] sm:$0xff] }
 0x3c2   : > { %2384 = vmatmul.mubr.msk.f32.vlgmr.msra.gmra.mrb[8].mxu1 %vm4189_vm5, %v1455_v41  ;;  %2937 = vmatmul.mubr.f32.vlgmr.msra.gmra.mrb[12].mxu0 %v1473_v4  ;;  %v3384_v41 = vpack.c.bf16 %v1740_v40, %v1739_v38  ;;  %v1931_v3 = vld [vmem:[#allocation12 + $0x88] sm:$0xff]  ;;  %v1917_v38 = vld [vmem:[#allocation12 + $0x18] sm:$0xff]  ;;  %v1934_v40 = vld [vmem:[#allocation12 + $0xa0] sm:$0xff] }
 0x3c3   : > { %1600 = vmatprep.mubr.f32.mxu1 %v1466_v5  ;;  %3335 = vmatpush3.bf16.msra.mxu1 %v3334_v63  ;;  %v3392_v63 = vpack.c.bf16 %v1744_v60, %v1743_v57  ;;  %v3396_v4 = vpack.c.bf16 %v1931_v3, %v1930_v0  ;;  %v1946_v5 = vld [vmem:[#allocation12 + $0x100] sm:$0xff]  ;;  %v3402_v44 = vpack.c.bf16 %v1917_v38, %v1916_v37  ;;  %v1936_v52 = vld [vmem:[#allocation12 + $0xb0] sm:$0xff]  ;;  %v1937_v53 = vld [vmem:[#allocation12 + $0xb8] sm:$0xff] }
 0x3c4   : > { %3367 = vmatpush3.bf16.msra.mxu0 %v3364_v48  ;;  %3337 = vmatprep.subr.bf16.mxu1 %v3336_v59  ;;  %v1721_v48 = vld [vmem:[#allocation10 + $0xc0] sm:$0xff]  ;;  %v3362_v59 = vpack.c.bf16 %v1712_v62, %v1711_v61  ;;  %v3428_v7 = vpack.c.bf16 %v1947_v6, %v1946_v5  ;;  %v3404_v45 = vpack.c.bf16 %v1935_v42, %v1934_v40  ;;  %v1920_v57 = vld [vmem:[#allocation12 + $0x30] sm:$0xff]  ;;  %v1939_v62 = vld [vmem:[#allocation12 + $0xc8] sm:$0xff] }
 0x3c5   : > { %3369 = vmatprep.subr.bf16.mxu0 %v3368_v8  ;;  %v3348_v29 = vpack.c.bf16 %v1722_v27, %v1721_v48  ;;  %v1915_v48 = vld [vmem:[#allocation12 + $0x8] sm:$0xff]  ;;  %v1932_v27 = vld [vmem:[#allocation12 + $0x90] sm:$0xff]  ;;  %v3408_v56 = vpack.c.bf16 %v1937_v53, %v1936_v52  ;;  %v1938_v61 = vld [vmem:[#allocation12 + $0xc0] sm:$0xff] }
 0x3c6   : > { %1601 = vmatmul.mubr.f32.gmra.mrb[10].mxu1 %v1457_v54  ;;  %v3388_v54 = vpack.c.bf16 %v1742_v50, %v1741_v46  ;;  %v3400_v36 = vpack.c.bf16 %v1933_v28, %v1932_v27  ;;  %v1918_v46 = vld [vmem:[#allocation12 + $0x20] sm:$0xff]  ;;  %v1923_v3 = vld [vmem:[#allocation12 + $0x48] sm:$0xff]  ;;  %v1944_v27 = vld [vmem:[#allocation12 + $0xf0] sm:$0xff] }
 0x3c7   : > { %3339 = vmatpush3.bf16.msra.mxu1 %v3338_v13  ;;  %v1922_v0 = vld [vmem:[#allocation12 + $0x40] sm:$0xff]  ;;  %v1955_v6 = vld [vmem:[#allocation12 + $0x148] sm:$0xff]  ;;  %v1945_v28 = vld [vmem:[#allocation12 + $0xf8] sm:$0xff] }
 0x3c8   : > { %3371 = vmatpush3.bf16.msra.mxu0 %v3368_v8  ;;  %3341 = vmatprep.subr.bf16.mxu1 %v3340_v14  ;;  %v3414_v5 = vpack.c.bf16 %v1923_v3, %v1922_v0  ;;  %v2123_v37 = vld [vmem:[%s4318_s15] sm:$0xff]  ;;  %v2124_v38 = vld [vmem:[%s4318_s15 + $0x8] sm:$0xff] }
 0x3c9   : > { %3373 = vmatprep.subr.bf16.mxu0 %v3372_v17 }
 0x3cb   : > { %3343 = vmatpush3.bf16.msra.mxu1 %v3342_v18 }
 0x3cc   : > { %3375 = vmatpush3.bf16.msra.mxu0 %v3372_v17  ;;  %3345 = vmatprep.subr.bf16.mxu1 %v3344_v22 }
 0x3cd   : > { %3377 = vmatprep.subr.bf16.mxu0 %v3376_v25 }
 0x3cf   : > { %3347 = vmatpush3.bf16.msra.mxu1 %v3346_v26  ;;  %v1914_v26 = vld [vmem:[#allocation12] sm:$0xff] }
 0x3d0   : > { %3379 = vmatpush3.bf16.msra.mxu0 %v3376_v25  ;;  %3349 = vmatprep.subr.bf16.mxu1 %v3348_v29  ;;  %v4218_v25 = vrot.slane %v3803_v24, 4  ;;  %v1948_v29 = vld [vmem:[#allocation12 + $0x110] sm:$0xff] }
 0x3d1   : > { %3381 = vmatprep.subr.bf16.mxu0 %v3380_v34 }
 0x3d3   : > { %3351 = vmatpush3.bf16.msra.mxu1 %v3350_v35 }
 0x3d4   : > { %3383 = vmatpush3.bf16.msra.mxu0 %v3380_v34  ;;  %3353 = vmatprep.subr.bf16.mxu1 %v3352_v39  ;;  %v3398_v34 = vpack.c.bf16 %v1915_v48, %v1914_v26  ;;  %v3432_v39 = vpack.c.bf16 %v1949_v30, %v1948_v29  ;;  %v1959_v26 = vld [vmem:[#allocation12 + $0x168] sm:$0xff]  ;;  %v3424_v29 = vpack.c.bf16 %v1945_v28, %v1944_v27  ;;  %v1928_v30 = vld [vmem:[#allocation12 + $0x70] sm:$0xff] }
 0x3d5   : > { %3385 = vmatprep.subr.bf16.mxu0 %v3384_v41 }
 0x3d7   : > { %3355 = vmatpush3.bf16.msra.mxu1 %v3354_v49 }
 0x3d8   : > { %3387 = vmatpush3.bf16.msra.mxu0 %v3384_v41  ;;  %3357 = vmatprep.subr.bf16.mxu1 %v3356_v47  ;;  %v1951_v41 = vld [vmem:[#allocation12 + $0x128] sm:$0xff] }
 0x3d9   : > { %3389 = vmatprep.subr.bf16.mxu0 %v3388_v54  ;;  %v1919_v47 = vld [vmem:[#allocation12 + $0x28] sm:$0xff]  ;;  %v3436_v50 = vpack.c.bf16 %v1951_v41, %v1950_v43  ;;  %v2385_v41 = vld [vmem:[%s4352_s23] ss:$0 sm:$0xff]  ;;  %s4354_s23 = sld [smem:[#allocation23_spill]] }
 0x3da   : > { %v3406_v55 = vpack.c.bf16 %v1919_v47, %v1918_v46 }
 0x3db   : > { %3359 = vmatpush3.bf16.msra.mxu1 %v3358_v51  ;;  %v1953_v51 = vld [vmem:[#allocation12 + $0x138] sm:$0xff] }
 0x3dc   : > { %3391 = vmatpush3.bf16.msra.mxu0 %v3388_v54  ;;  %3361 = vmatprep.subr.bf16.mxu1 %v3360_v58  ;;  %v1952_v54 = vld [vmem:[#allocation12 + $0x130] sm:$0xff]  ;;  %v1921_v58 = vld [vmem:[#allocation12 + $0x38] sm:$0xff] }
 0x3dd   : > { %3393 = vmatprep.subr.bf16.mxu0 %v3392_v63  ;;  %v3440_v60 = vpack.c.bf16 %v1953_v51, %v1952_v54 }
 0x3df   : > { %3363 = vmatpush3.bf16.msra.mxu1 %v3362_v59  ;;  %v3412_v59 = vpack.c.bf16 %v1939_v62, %v1938_v61 }
 0x3e0   : > { %3395 = vmatpush3.bf16.msra.mxu0 %v3392_v63  ;;  %3397 = vmatprep.subr.bf16.mxu1 %v3396_v4  ;;  %v3410_v63 = vpack.c.bf16 %v1921_v58, %v1920_v57  ;;  %v1954_v4 = vld [vmem:[#allocation12 + $0x140] sm:$0xff] }
 0x3e1   : > { %3429 = vmatprep.subr.bf16.mxu0 %v3428_v7 }
 0x495   : > { %v2610_v8 = vpop.f32.mrb[8].mxu1  ;;  %v2938_v9 = vpop.f32.mrb[12].mxu0 }
 0x496   : > { %v2611_v10 = vpop.f32.mrb[9].mxu1  ;;  %v1672_v12 = vpop.f32.mrb[13].mxu0 }
 0x497   : > { %v2612_v13 = vadd.f32 %v2611_v10, %v2610_v8  ;;  %v1940_v8 = vld [vmem:[#allocation12 + $0xd0] sm:$0xff] }
 0x499   : > { %v1598_v14 = vadd.f32 %v2612_v13, %v2382_v11  ;;  %v2613_v15 = vpop.f32.mrb[10].mxu1  ;;  %v1956_v13 = vld [vmem:[#allocation12 + $0x150] sm:$0xff] }
 0x49a   : > { %v2614_v16 = vpop.f32.mrb[11].mxu1 }
 0x49b   : > { %v1673_v17 = vadd.f32 %v1672_v12, %v1598_v14  ;;  %v2615_v19 = vadd.f32 %v2614_v16, %v2613_v15  ;;  %v1925_v12 = vld [vmem:[#allocation12 + $0x58] sm:$0xff] }
 0x49c   : > { %v1957_v15 = vld [vmem:[#allocation12 + $0x158] sm:$0xff] }
 0x49d   : > { %v1681_v32 = vmul.f32 0.01, %v1673_v17  ;;  %v1603_v20 = vadd.f32 %v2615_v19, %v2382_v11  ;;  %v1924_v11 = vld [vmem:[#allocation12 + $0x50] sm:$0xff]  ;;  %v3448_v16 = vpack.c.bf16 %v1957_v15, %v1956_v13  ;;  %v1943_v19 = vld [vmem:[#allocation12 + $0xe8] sm:$0xff]  ;;  %v2138_v15 = vld [vmem:[%s4318_s15 + $0x78] sm:$0xff] }
 0x49e   : > { %v3418_v14 = vpack.c.bf16 %v1925_v12, %v1924_v11  ;;  %v2135_v11 = vld [vmem:[%s4318_s15 + $0x60] sm:$0xff]  ;;  %v2136_v12 = vld [vmem:[%s4318_s15 + $0x68] sm:$0xff] }
 0x49f   : > { %v1683_v21 = vmax.f32 %v1673_v17, %v1681_v32  ;;  %v1678_v18 = vadd.f32 %v2938_v9, %v1603_v20  ;;  %v1941_v9 = vld [vmem:[#allocation12 + $0xd8] sm:$0xff]  ;;  %v1942_v17 = vld [vmem:[#allocation12 + $0xe0] sm:$0xff]  ;;  %v3484_v13 = vpack.c.bf16 %v2136_v12, %v2135_v11 }
 0x4a0   : > { %v3416_v10 = vpack.c.bf16 %v1941_v9, %v1940_v8  ;;  %v3420_v32 = vpack.c.bf16 %v1943_v19, %v1942_v17  ;;  %v1926_v20 = vld [vmem:[#allocation12 + $0x60] sm:$0xff]  ;;  %v2133_v9 = vld [vmem:[%s4318_s15 + $0x50] sm:$0xff] }
 0x4a1   : > { %v4215_v22 = vadd.f32 %v1683_v21, %v4182_v2  ;;  %v1682_v23 = vmul.f32 0.01, %v1678_v18  ;;  %v1927_v21 = vld [vmem:[#allocation12 + $0x68] sm:$0xff] }
 0x4a3   : > { %v1684_v31 = vmax.f32 %v1678_v18, %v1682_v23  ;;  %2971 = vmatprep.mubr.f32.mxu0 %v4215_v22  ;;  %v1691_v33 = vrot.slane %v4215_v22, 4  ;;  %v1958_v18 = vld [vmem:[#allocation12 + $0x160] sm:$0xff]  ;;  %v3422_v23 = vpack.c.bf16 %v1927_v21, %v1926_v20 }
 0x4a4   : > { %v3452_v48 = vpack.c.bf16 %v1959_v26, %v1958_v18  ;;  %v2386_v20 = vld [vmem:[%s4353_s26] ss:$0 sm:$0xff] }
 0x4a5   : > { %v1692_v2 = vsel %vm1222_vm4, %v4218_v25, %v1691_v33  ;;  %v4225_v35 = vadd.f32 %v1684_v31, %v4180_v1  ;;  %v1929_v31 = vld [vmem:[#allocation12 + $0x78] sm:$0xff] }
 0x4a6   : > { %1816 = vmatprep.mubr.f32.mxu1 %v1692_v2  ;;  %v1961_v2 = vld [vmem:[#allocation12 + $0x178] sm:$0xff] }
 0x4a7   : > { %1817 = vmatmul.mubr.f32.vlgmr.msra.gmra.mrb[12].mxu1 %v3803_v24  ;;  %2972 = vmatmul.mubr.f32.vlgmr.msra.gmra.mrb[14].mxu0 %v4225_v35  ;;  %v1693_v49 = vrot.slane %v4225_v35, 4 }
 0x4a8   : > { %3399 = vmatpush3.bf16.msra.mxu1 %v3398_v34  ;;  %3431 = vmatpush3.bf16.msra.mxu0 %v3428_v7  ;;  %v3444_v7 = vpack.c.bf16 %v1955_v6, %v1954_v4  ;;  %v3426_v34 = vpack.c.bf16 %v1929_v31, %v1928_v30  ;;  %v2131_v6 = vld [vmem:[%s4318_s15 + $0x40] sm:$0xff] }
 0x4a9   : > { %v1694_v1 = vsel %vm1222_vm4, %v1691_v33, %v1693_v49  ;;  %3401 = vmatprep.subr.bf16.mxu1 %v3400_v36  ;;  %3433 = vmatprep.subr.bf16.mxu0 %v3432_v39  ;;  %v1960_v33 = vld [vmem:[#allocation12 + $0x170] sm:$0xff] }
 0x4aa   : > { %1821 = vmatprep.mubr.f32.mxu1 %v1694_v1  ;;  %v3456_v36 = vpack.c.bf16 %v1961_v2, %v1960_v33 }
 0x4ab   : > { %1822 = vmatmul.mubr.f32.gmra.mrb[14].mxu1 %v4215_v22 }
 0x4ac   : > { %3403 = vmatpush3.bf16.msra.mxu1 %v3402_v44  ;;  %3435 = vmatpush3.bf16.msra.mxu0 %v3432_v39  ;;  %v3460_v39 = vpack.c.bf16 %v2124_v38, %v2123_v37 }
 0x4ad   : > { %3405 = vmatprep.subr.bf16.mxu1 %v3404_v45  ;;  %3437 = vmatprep.subr.bf16.mxu0 %v3436_v50 }
 0x4b0   : > { %3407 = vmatpush3.bf16.msra.mxu1 %v3406_v55  ;;  %3439 = vmatpush3.bf16.msra.mxu0 %v3436_v50  ;;  %v2125_v55 = vld [vmem:[%s4318_s15 + $0x10] sm:$0xff] }
 0x4b1   : > { %3409 = vmatprep.subr.bf16.mxu1 %v3408_v56  ;;  %3441 = vmatprep.subr.bf16.mxu0 %v3440_v60  ;;  %v2126_v56 = vld [vmem:[%s4318_s15 + $0x18] sm:$0xff] }
 0x4b2   : > { %v3464_v62 = vpack.c.bf16 %v2126_v56, %v2125_v55 }
 0x4b4   : > { %3411 = vmatpush3.bf16.msra.mxu1 %v3410_v63  ;;  %3443 = vmatpush3.bf16.msra.mxu0 %v3440_v60  ;;  %v2127_v63 = vld [vmem:[%s4318_s15 + $0x20] sm:$0xff] }
 0x4b5   : > { %3413 = vmatprep.subr.bf16.mxu1 %v3412_v59  ;;  %3445 = vmatprep.subr.bf16.mxu0 %v3444_v7  ;;  %v2128_v59 = vld [vmem:[%s4318_s15 + $0x28] sm:$0xff] }
 0x4b6   : > { %v3468_v4 = vpack.c.bf16 %v2128_v59, %v2127_v63 }
 0x4b8   : > { %3415 = vmatpush3.bf16.msra.mxu1 %v3414_v5  ;;  %3447 = vmatpush3.bf16.msra.mxu0 %v3444_v7  ;;  %v2130_v5 = vld [vmem:[%s4318_s15 + $0x38] sm:$0xff]  ;;  %v2132_v7 = vld [vmem:[%s4318_s15 + $0x48] sm:$0xff] }
 0x4b9   : > { %3417 = vmatprep.subr.bf16.mxu1 %v3416_v10  ;;  %3449 = vmatprep.subr.bf16.mxu0 %v3448_v16  ;;  %v3476_v8 = vpack.c.bf16 %v2132_v7, %v2131_v6 }
 0x4bc   : > { %3419 = vmatpush3.bf16.msra.mxu1 %v3418_v14  ;;  %3451 = vmatpush3.bf16.msra.mxu0 %v3448_v16  ;;  %v2137_v14 = vld [vmem:[%s4318_s15 + $0x70] sm:$0xff] }
 0x4bd   : > { %3421 = vmatprep.subr.bf16.mxu1 %v3420_v32  ;;  %3453 = vmatprep.subr.bf16.mxu0 %v3452_v48  ;;  %v3488_v16 = vpack.c.bf16 %v2138_v15, %v2137_v14 }
 0x4c0   : > { %3423 = vmatpush3.bf16.msra.mxu1 %v3422_v23  ;;  %3455 = vmatpush3.bf16.msra.mxu0 %v3452_v48 }
 0x4c1   : > { %3425 = vmatprep.subr.bf16.mxu1 %v3424_v29  ;;  %3457 = vmatprep.subr.bf16.mxu0 %v3456_v36 }
 0x4c4   : > { %3427 = vmatpush3.bf16.msra.mxu1 %v3426_v34  ;;  %3459 = vmatpush3.bf16.msra.mxu0 %v3456_v36 }
 0x4c5   : > { %3461 = vmatprep.subr.bf16.mxu1 %v3460_v39 }
 0x57a   : > { %v2666_v40 = vpop.f32.mrb[12].mxu1  ;;  %v2973_v42 = vpop.f32.mrb[14].mxu0 }
 0x57b   : > { %v2667_v43 = vpop.f32.mrb[13].mxu1  ;;  %v1893_v49 = vpop.f32.mrb[15].mxu0 }
 0x57c   : > { %v2668_v44 = vadd.f32 %v2667_v43, %v2666_v40 }
 0x57e   : > { %v1819_v1 = vadd.f32 %v2668_v44, %v2385_v41  ;;  %v2669_v45 = vpop.f32.mrb[14].mxu1 }
 0x57f   : > { %v2670_v46 = vpop.f32.mrb[15].mxu1 }
 0x580   : > { %v1894_v47 = vadd.f32 %v1893_v49, %v1819_v1  ;;  %v2671_v50 = vadd.f32 %v2670_v46, %v2669_v45 }
 0x582   : > { %v1902_v52 = vmul.f32 0.01, %v1894_v47  ;;  %v1824_v53 = vadd.f32 %v2671_v50, %v2385_v41 }
 0x584   : > { %v1904_v54 = vmax.f32 %v1894_v47, %v1902_v52  ;;  %v1899_v51 = vadd.f32 %v2973_v42, %v1824_v53 }
 0x586   : > { %v1903_v57 = vmul.f32 0.01, %v1899_v51  ;;  %3006 = vmatprep.mubr.f32.mxu0 %v1904_v54  ;;  %v1908_v58 = vrot.slane %v1904_v54, 4 }
 0x588   : > { %v1905_v60 = vmax.f32 %v1899_v51, %v1903_v57  ;;  %v1909_v61 = vsel %vm1222_vm4, %v4218_v25, %v1908_v58  ;;  %v2129_v25 = vld [vmem:[%s4318_s15 + $0x30] sm:$0xff] }
 0x589   : > { %2033 = vmatprep.mubr.f32.mxu1 %v1909_v61 }
 0x58a   : > { %2034 = vmatmul.mubr.f32.vlgmr.msra.gmra.mrb[16].mxu1 %v3803_v24  ;;  %3007 = vmatmul.mubr.f32.vlgmr.msra.gmra.mrb[16].mxu0 %v1905_v60  ;;  %v1910_v0 = vrot.slane %v1905_v60, 4  ;;  %v3472_v24 = vpack.c.bf16 %v2130_v5, %v2129_v25 }
 0x58b   : > { %3463 = vmatpush3.bf16.msra.mxu1 %v3460_v39 }
 0x58c   : > { %v1911_v3 = vsel %vm1222_vm4, %v1908_v58, %v1910_v0  ;;  %3465 = vmatprep.subr.bf16.mxu1 %v3464_v62 }
 0x58d   : > { %2038 = vmatprep.mubr.f32.mxu1 %v1911_v3 }
 0x58e   : > { %2039 = vmatmul.mubr.f32.gmra.mrb[18].mxu1 %v1904_v54 }
 0x58f   : > { %3467 = vmatpush3.bf16.msra.mxu1 %v3464_v62  ;;  %3041 = vmatprep.mubr.f32.mxu1 %v4215_v22  ;;  %v2134_v22 = vld [vmem:[%s4318_s15 + $0x58] sm:$0xff] }
 0x590   : > { %3469 = vmatprep.subr.bf16.mxu1 %v3468_v4  ;;  %v3480_v10 = vpack.c.bf16 %v2134_v22, %v2133_v9 }
 0x593   : > { %3471 = vmatpush3.bf16.msra.mxu1 %v3468_v4 }
 0x594   : > { %3473 = vmatprep.subr.bf16.mxu1 %v3472_v24 }
 0x597   : > { %3475 = vmatpush3.bf16.msra.mxu1 %v3472_v24 }
 0x598   : > { %3477 = vmatprep.subr.bf16.mxu1 %v3476_v8 }
 0x59b   : > { %3479 = vmatpush3.bf16.msra.mxu1 %v3476_v8 }
 0x59c   : > { %3481 = vmatprep.subr.bf16.mxu1 %v3480_v10 }
 0x59f   : > { %3483 = vmatpush3.bf16.msra.mxu1 %v3480_v10 }
 0x5a0   : > { %3485 = vmatprep.subr.bf16.mxu1 %v3484_v13 }
 0x5a3   : > { %3487 = vmatpush3.bf16.msra.mxu1 %v3484_v13 }
 0x5a4   : > { %3489 = vmatprep.subr.bf16.mxu1 %v3488_v16 }
 0x5a7   : > { %3491 = vmatpush3.bf16.msra.mxu1 %v3488_v16 }
 0x5aa   : > { %3042 = vmatmul.mubr.f32.vlgmr.msra.gmra.mrb[20].mxu1 %v4225_v35  ;;  %v2387_v35 = vld [vmem:[%s4354_s23] ss:$0 sm:$0xff] }
 0x65d   : > { %v2722_v17 = vpop.f32.mrb[16].mxu1  ;;  %v3008_v19 = vpop.f32.mrb[16].mxu0 }
 0x65e   : > { %v2723_v32 = vpop.f32.mrb[17].mxu1  ;;  %v2110_v21 = vpop.f32.mrb[17].mxu0 }
 0x65f   : > { %v2724_v18 = vadd.f32 %v2723_v32, %v2722_v17 }
 0x661   : > { %v2036_v23 = vadd.f32 %v2724_v18, %v2386_v20  ;;  %v2725_v26 = vpop.f32.mrb[18].mxu1 }
 0x662   : > { %v2726_v48 = vpop.f32.mrb[19].mxu1 }
 0x663   : > { %v2111_v27 = vadd.f32 %v2110_v21, %v2036_v23  ;;  %v2727_v28 = vadd.f32 %v2726_v48, %v2725_v26 }
 0x665   : > { %v2041_v29 = vadd.f32 %v2727_v28, %v2386_v20  ;;  %v2119_v33 = vmul.f32 0.01, %v2111_v27 }
 0x667   : > { %v2116_v30 = vadd.f32 %v3008_v19, %v2041_v29  ;;  %v2121_v38 = vmax.f32 %v2111_v27, %v2119_v33 }
 0x669   : > { %v2120_v31 = vmul.f32 0.01, %v2116_v30 }
 0x66b   : > { %v2122_v2 = vmax.f32 %v2116_v30, %v2120_v31 }
 0x67d   : > { %v3043_v34 = vpop.f32.mrb[20].mxu1 }
 0x67e   : > { %v2218_v36 = vadd.f32 %v3043_v34, %v2387_v35  ;;  %v2212_v37 = vpop.f32.mrb[21].mxu1 }
 0x67f   : > { %v2213_v39 = vadd.f32 %v2387_v35, %v2212_v37 }
 0x680   : > { %v2222_v40 = vadd.f32 %v2218_v36, %v2122_v2 }
 0x681   : > { %v2221_v42 = vadd.f32 %v2213_v39, %v2121_v38 }
 0x682   : > { %2224 = vst [vmem:[%s650_s12 + $0x8] sm:$0xff] %v2222_v40 }
 0x683   : > { %2223 = vst [vmem:[%s650_s12] sm:$0xff] %v2221_v42 }
 0x684 PF: > { %s4356_s16 = sld [smem:[#allocation17_spill]] }
 0x68a   : > { %s31_s24 = sadd.s32 1, %s4356_s16  }
 0x68b   : > { %p28_p9 = scmp.ge.s32.totalorder %s31_s24, 4  }
 0x68d   :  { %30 = sbr.rel (!%p28_p9) target bundleno = 12 (0xc), region = 147 }
 0x694   :  { %2246 = vsyncpa [#allocation3], 1 }
 0x695   :  { %2248 = vsyncpa [#allocation3 + $0x1], 1 }
 0x696   :  { %2249 = vsyncpa [#allocation5], 1 }
 0x697   :  { %2250 = vsyncpa [#allocation8], 1 }
 0x698   :  { %2251 = vsyncpa [#allocation11], 1 }

</bundles_post_ra>
